<compile_context>
chip_gen: v7x
topology: tpu7x:2x2x1
jax: 0.10.0
libtpu: 0.0.40
codegen_flags: <defaults>
</compile_context>

<pallas_src>
import jax
import jax.numpy as jnp
from jax.experimental import pallas as pl
from jax.experimental.pallas import tpu as pltpu


def _silu(x):
    return x * jax.nn.sigmoid(x)


def _moe_kernel(gw_ref, x_ref, e_gu_ref, e_down_ref, s_gu_ref, s_down_ref,
                o_ref, acc_ref):
    e = pl.program_id(1)
    num_experts = pl.num_programs(1)
    x = x_ref[...]                                        # (tT, H) bf16

    # ---- shared expert MLP: computed once per token tile (first expert step) ----
    @pl.when(e == 0)
    def _():
        i_sh = s_gu_ref.shape[1] // 2
        sgu = jnp.dot(x, s_gu_ref[...], preferred_element_type=jnp.float32)   # (tT, 2*Is)
        sh = (_silu(sgu[:, :i_sh]) * sgu[:, i_sh:]).astype(s_down_ref.dtype)
        acc_ref[...] = jnp.dot(sh, s_down_ref[...], preferred_element_type=jnp.float32)

    # ---- routed expert e (weights streamed per grid step) ----
    gw = gw_ref[...]                                      # (tT, E) f32, 0 if not selected
    col = jax.lax.broadcasted_iota(jnp.int32, gw.shape, 1)
    w_e = jnp.sum(jnp.where(col == e, gw, 0.0), axis=-1, keepdims=True)       # (tT, 1)

    # Skip the 3 matmuls entirely if no token in this tile routed to expert e.
    @pl.when(jnp.any(w_e != 0.0))
    def _():
        i_moe = e_gu_ref.shape[2] // 2
        gu = jnp.dot(x, e_gu_ref[0], preferred_element_type=jnp.float32)      # (tT, 2*I)
        h = (_silu(gu[:, :i_moe]) * gu[:, i_moe:]).astype(e_down_ref.dtype)
        eo = jnp.dot(h, e_down_ref[0], preferred_element_type=jnp.float32)    # (tT, H)
        acc_ref[...] += w_e * eo

    # ---- writeback once all experts for this tile are accumulated ----
    @pl.when(e == num_experts - 1)
    def _():
        o_ref[...] = acc_ref[...].astype(o_ref.dtype)


def _routing(x_f32, gate_w_f32, top_k):
    """softmax over combined-gate logits, then top-k mask (no renormalization)."""
    logits = jnp.dot(x_f32, gate_w_f32, preferred_element_type=jnp.float32)   # (T, E)
    p = jax.nn.softmax(logits, axis=-1)
    vals, idx = jax.lax.top_k(p, top_k)
    num_experts = gate_w_f32.shape[1]
    gw = jnp.sum(jax.nn.one_hot(idx, num_experts, dtype=p.dtype) * vals[..., None],
                 axis=1)
    return gw                                             # (T, E): p_e if selected else 0


def distributed_qwen2_moe_block(hidden_states, params, *, top_k, token_tile=128):
    """hidden_states: (B, S, H) float32 -> (B, S, H) float32."""
    B, S, H = hidden_states.shape
    T = B * S
    x = hidden_states.reshape(T, H)

    # Router stays in the module dtype (f32 here), computed outside the kernel.
    gate_w = params["gate_w"].astype(jnp.float32)         # (H, E)
    E = gate_w.shape[1]
    gw = _routing(x.astype(jnp.float32), gate_w, top_k)   # (T, E) f32

    # bf16 weights/activations for the MXU; fuse gate_proj + up_proj.
    wdt = jnp.bfloat16
    e_gu = jnp.concatenate([params["e_gate"], params["e_up"]], axis=2).astype(wdt)  # (E, H, 2I)
    e_down = params["e_down"].astype(wdt)                                           # (E, I, H)
    s_gu = jnp.concatenate([params["s_gate"], params["s_up"]], axis=1).astype(wdt)  # (H, 2Is)
    s_down = params["s_down"].astype(wdt)                                           # (Is, H)
    xb = x.astype(wdt)

    I2 = e_gu.shape[2]
    I = I2 // 2
    Is2 = s_gu.shape[1]
    Is = Is2 // 2

    # Pad the token dimension to a multiple of the tile (padded rows discarded).
    T_pad = ((T + token_tile - 1) // token_tile) * token_tile
    if T_pad != T:
        pad = T_pad - T
        xb = jnp.pad(xb, ((0, pad), (0, 0)))
        gw = jnp.pad(gw, ((0, pad), (0, 0)))
    n_tiles = T_pad // token_tile

    # VMEM budget (double-buffered streamed operands + resident shared weights).
    bpe = 2  # bf16
    vmem_bytes = (
        2 * token_tile * H * bpe        # x tile
        + 2 * token_tile * E * 4        # gate weights tile
        + 2 * H * I2 * bpe              # expert gate+up block
        + 2 * I * H * bpe               # expert down block
        + 2 * H * Is2 * bpe             # shared gate+up
        + 2 * Is * H * bpe              # shared down
        + 2 * token_tile * H * 4        # output tile
        + token_tile * H * 4            # f32 accumulator scratch
    )
    vmem_limit = int(min(max(2 * vmem_bytes, 32 * 1024 * 1024), 100 * 1024 * 1024))

    flops = 2 * T_pad * (H * I2 + I * H) * E + 2 * T_pad * (H * Is2 + Is * H)
    transcendentals = T_pad * (I * E + Is)
    bytes_accessed = (xb.size * bpe + gw.size * 4 + e_gu.size * bpe + e_down.size * bpe
                      + s_gu.size * bpe + s_down.size * bpe + T_pad * H * 4)
    cost = pl.CostEstimate(flops=int(flops), transcendentals=int(transcendentals),
                           bytes_accessed=int(bytes_accessed))

    out = pl.pallas_call(
        _moe_kernel,
        out_shape=jax.ShapeDtypeStruct((T_pad, H), hidden_states.dtype),
        grid=(n_tiles, E),
        in_specs=[
            pl.BlockSpec((token_tile, E), lambda i, e: (i, 0)),   # masked gate weights
            pl.BlockSpec((token_tile, H), lambda i, e: (i, 0)),   # x tile (bf16)
            pl.BlockSpec((1, H, I2), lambda i, e: (e, 0, 0)),     # expert gate+up (streamed)
            pl.BlockSpec((1, I, H), lambda i, e: (e, 0, 0)),      # expert down (streamed)
            pl.BlockSpec((H, Is2), lambda i, e: (0, 0)),          # shared gate+up (resident)
            pl.BlockSpec((Is, H), lambda i, e: (0, 0)),           # shared down (resident)
        ],
        out_specs=pl.BlockSpec((token_tile, H), lambda i, e: (i, 0)),
        scratch_shapes=[pltpu.VMEM((token_tile, H), jnp.float32)],
        compiler_params=pltpu.CompilerParams(
            dimension_semantics=("parallel", "arbitrary"),
            vmem_limit_bytes=vmem_limit),
        cost_estimate=cost,
    )(gw, xb, e_gu, e_down, s_gu, s_down)

    return out[:T].reshape(B, S, H)


def _reference(hidden_states, params, top_k):
    """Pure-JAX reference with the same bf16-input / f32-accumulate numerics."""
    B, S, H = hidden_states.shape
    x = hidden_states.reshape(-1, H)
    gate_w = params["gate_w"].astype(jnp.float32)
    E = gate_w.shape[1]
    gw = _routing(x.astype(jnp.float32), gate_w, top_k)

    wdt = jnp.bfloat16
    xb = x.astype(wdt)

    def mlp(h, wg, wu, wd):
        g = jnp.dot(h, wg.astype(wdt), preferred_element_type=jnp.float32)
        u = jnp.dot(h, wu.astype(wdt), preferred_element_type=jnp.float32)
        a = (_silu(g) * u).astype(wdt)
        return jnp.dot(a, wd.astype(wdt), preferred_element_type=jnp.float32)

    out = mlp(xb, params["s_gate"], params["s_up"], params["s_down"])
    for e in range(E):
        eo = mlp(xb, params["e_gate"][e], params["e_up"][e], params["e_down"][e])
        out = out + gw[:, e:e + 1] * eo
    return out.astype(hidden_states.dtype).reshape(B, S, H)


if __name__ == "__main__":
    # Small, lane-aligned shapes consistent with the module's forward.
    B, S, H = 2, 64, 128        # batch, sequence, hidden_dim  (T = 128 tokens)
    E = 4                       # group_size == number of combined experts (1/rank)
    TOP_K = 2
    I_MOE = 128                 # per-expert intermediate size
    I_SHARED = 256              # shared-expert intermediate size

    key = jax.random.PRNGKey(0)
    ks = jax.random.split(key, 8)
    scale = 0.05
    params = {
        # weights stored (in, out); PyTorch Linear is (out, in) and does x @ W^T
        "gate_w": scale * jax.random.normal(ks[0], (H, E), jnp.float32),
        "e_gate": scale * jax.random.normal(ks[1], (E, H, I_MOE), jnp.float32),
        "e_up":   scale * jax.random.normal(ks[2], (E, H, I_MOE), jnp.float32),
        "e_down": scale * jax.random.normal(ks[3], (E, I_MOE, H), jnp.float32),
        "s_gate": scale * jax.random.normal(ks[4], (H, I_SHARED), jnp.float32),
        "s_up":   scale * jax.random.normal(ks[5], (H, I_SHARED), jnp.float32),
        "s_down": scale * jax.random.normal(ks[6], (I_SHARED, H), jnp.float32),
    }
    hidden_states = jax.random.normal(ks[7], (B, S, H), jnp.float32)

    run = jax.jit(lambda h, p: distributed_qwen2_moe_block(h, p, top_k=TOP_K))
    out = jax.block_until_ready(run(hidden_states, params))

    ref = _reference(hidden_states, params, TOP_K)
    assert out.shape == (B, S, H) and out.dtype == jnp.float32
    err = float(jnp.max(jnp.abs(out - ref)))
    assert jnp.allclose(out, ref, rtol=1e-2, atol=1e-2), err

    print("KERNEL_OK")
</pallas_src>

<mosaic_0001>
module attributes {stable_mosaic.version = 11 : i64} {
  func.func @_moe_kernel(%arg0: i32, %arg1: i32, %arg2: memref<128x4xf32, #tpu.memory_space<vmem>>, %arg3: memref<128x128xbf16, #tpu.memory_space<vmem>>, %arg4: memref<1x128x256xbf16, #tpu.memory_space<vmem>>, %arg5: memref<1x128x128xbf16, #tpu.memory_space<vmem>>, %arg6: memref<128x512xbf16, #tpu.memory_space<vmem>>, %arg7: memref<256x128xbf16, #tpu.memory_space<vmem>>, %arg8: memref<128x128xf32, #tpu.memory_space<vmem>>, %arg9: memref<128x128xf32, #tpu.memory_space<vmem>>) attributes {dimension_semantics = [#tpu.dimension_semantics<parallel>, #tpu.dimension_semantics<arbitrary>], iteration_bounds = array<i64: 1, 4>, scalar_prefetch = 0 : i64, scratch_operands = 1 : i64, tpu.core_type = #tpu.core_type<tc>, window_params = [{transform_indices = @transform_0, window_bounds = array<i64: 128, 4>}, {transform_indices = @transform_1, window_bounds = array<i64: 128, 128>}, {transform_indices = @transform_2, window_bounds = array<i64: 1, 128, 256>}, {transform_indices = @transform_3, window_bounds = array<i64: 1, 128, 128>}, {pipeline_mode = #tpu.pipeline_mode<synchronous>, transform_indices = @transform_4, window_bounds = array<i64: 128, 512>}, {pipeline_mode = #tpu.pipeline_mode<synchronous>, transform_indices = @transform_5, window_bounds = array<i64: 256, 128>}, {transform_indices = @transform_6, window_bounds = array<i64: 128, 128>}]} {
    %c0 = arith.constant 0 : index
    %c0_0 = arith.constant 0 : index
    %0 = vector.load %arg3[%c0, %c0_0] : memref<128x128xbf16, #tpu.memory_space<vmem>>, vector<128x128xbf16>
    %c0_i32 = arith.constant 0 : i32
    %1 = arith.cmpi eq, %arg1, %c0_i32 : i32
    %2 = arith.extui %1 : i1 to i32
    %c0_i32_1 = arith.constant 0 : i32
    %3 = arith.cmpi ne, %2, %c0_i32_1 : i32
    scf.if %3 {
      %c0_12 = arith.constant 0 : index
      %c0_13 = arith.constant 0 : index
      %27 = vector.load %arg6[%c0_12, %c0_13] : memref<128x512xbf16, #tpu.memory_space<vmem>>, vector<128x512xbf16>
      %cst_14 = arith.constant dense<0.000000e+00> : vector<128x512xf32>
      %28 = tpu.matmul %0, %27, %cst_14 {dimension_numbers = #tpu.dot_dimension_numbers<[1], [0], [0], [1], [0, 0, 1, 1], [], []>} : vector<128x128xbf16>, vector<128x512xbf16>, vector<128x512xf32> -> vector<128x512xf32>
      %29 = vector.extract_strided_slice %28 {offsets = [0, 0], sizes = [128, 256], strides = [1, 1]} : vector<128x512xf32> to vector<128x256xf32>
      %30 = arith.negf %29 : vector<128x256xf32>
      %31 = math.exp %30 : vector<128x256xf32>
      %cst_15 = arith.constant 1.000000e+00 : f32
      %32 = vector.broadcast %cst_15 : f32 to vector<128x256xf32>
      %33 = arith.addf %32, %31 : vector<128x256xf32>
      %34 = arith.divf %32, %33 : vector<128x256xf32>
      %35 = arith.mulf %29, %34 : vector<128x256xf32>
      %36 = vector.extract_strided_slice %28 {offsets = [0, 256], sizes = [128, 256], strides = [1, 1]} : vector<128x512xf32> to vector<128x256xf32>
      %37 = arith.mulf %35, %36 : vector<128x256xf32>
      %38 = arith.truncf %37 : vector<128x256xf32> to vector<128x256xbf16>
      %c0_16 = arith.constant 0 : index
      %c0_17 = arith.constant 0 : index
      %39 = vector.load %arg7[%c0_16, %c0_17] : memref<256x128xbf16, #tpu.memory_space<vmem>>, vector<256x128xbf16>
      %cst_18 = arith.constant dense<0.000000e+00> : vector<128x128xf32>
      %40 = tpu.matmul %38, %39, %cst_18 {dimension_numbers = #tpu.dot_dimension_numbers<[1], [0], [0], [1], [0, 0, 1, 1], [], []>} : vector<128x256xbf16>, vector<256x128xbf16>, vector<128x128xf32> -> vector<128x128xf32>
      %c0_19 = arith.constant 0 : index
      %c0_20 = arith.constant 0 : index
      %41 = vector.load %arg9[%c0_19, %c0_20] : memref<128x128xf32, #tpu.memory_space<vmem>>, vector<128x128xf32>
      tpu.vector_store %arg9[%c0_19, %c0_20], %40 {strides = array<i32>} : memref<128x128xf32, #tpu.memory_space<vmem>>, vector<128x128xf32>,
    } else {
    }
    %c0_2 = arith.constant 0 : index
    %c0_3 = arith.constant 0 : index
    %4 = vector.load %arg2[%c0_2, %c0_3] : memref<128x4xf32, #tpu.memory_space<vmem>>, vector<128x4xf32>
    %5 = tpu.iota {dimensions = array<i32: 1>} : vector<128x4xi32>
    %6 = vector.broadcast %arg1 : i32 to vector<128x4xi32>
    %7 = arith.cmpi eq, %5, %6 : vector<128x4xi32>
    %cst = arith.constant 0.000000e+00 : f32
    %8 = vector.broadcast %cst : f32 to vector<128x4xf32>
    %9 = arith.select %7, %4, %8 : vector<128x4xi1>, vector<128x4xf32>
    %cst_4 = arith.constant dense<0.000000e+00> : vector<128xf32>
    %10 = vector.multi_reduction <add>, %9, %cst_4 [1] : vector<128x4xf32> to vector<128xf32>
    %11 = vector.shape_cast %10 : vector<128xf32> to vector<128x1xf32>
    %cst_5 = arith.constant 0.000000e+00 : f32
    %12 = vector.broadcast %cst_5 : f32 to vector<128x1xf32>
    %13 = arith.cmpf one, %11, %12 : vector<128x1xf32>
    %cst_6 = arith.constant 1.000000e+00 : f32
    %cst_7 = arith.constant 0.000000e+00 : f32
    %14 = vector.broadcast %cst_6 : f32 to vector<128x1xf32>
    %15 = vector.broadcast %cst_7 : f32 to vector<128x1xf32>
    %16 = arith.select %13, %14, %15 : vector<128x1xi1>, vector<128x1xf32>
    %17 = vector.shape_cast %16 : vector<128x1xf32> to vector<1x128x1xf32>
    %cst_8 = arith.constant dense<0xFF800000> : vector<1xf32>
    %18 = vector.multi_reduction <maximumf>, %17, %cst_8 [1, 2] : vector<1x128x1xf32> to vector<1xf32>
    %19 = vector.shape_cast %18 : vector<1xf32> to vector<1x1x1xf32>
    %20 = vector.extract %19[0, 0, 0] : f32 from vector<1x1x1xf32>
    %cst_9 = arith.constant 0.000000e+00 : f32
    %21 = arith.cmpf ogt, %20, %cst_9 : f32
    %22 = arith.extui %21 : i1 to i32
    %c0_i32_10 = arith.constant 0 : i32
    %23 = arith.cmpi ne, %22, %c0_i32_10 : i32
    scf.if %23 {
      %c0_12 = arith.constant 0 : index
      %c0_13 = arith.constant 0 : index
      %c0_14 = arith.constant 0 : index
      %27 = vector.load %arg4[%c0_12, %c0_13, %c0_14] : memref<1x128x256xbf16, #tpu.memory_space<vmem>>, vector<1x128x256xbf16>
      %28 = vector.shape_cast %27 : vector<1x128x256xbf16> to vector<128x256xbf16>
      %cst_15 = arith.constant dense<0.000000e+00> : vector<128x256xf32>
      %29 = tpu.matmul %0, %28, %cst_15 {dimension_numbers = #tpu.dot_dimension_numbers<[1], [0], [0], [1], [0, 0, 1, 1], [], []>} : vector<128x128xbf16>, vector<128x256xbf16>, vector<128x256xf32> -> vector<128x256xf32>
      %30 = vector.extract_strided_slice %29 {offsets = [0, 0], sizes = [128, 128], strides = [1, 1]} : vector<128x256xf32> to vector<128x128xf32>
      %31 = arith.negf %30 : vector<128x128xf32>
      %32 = math.exp %31 : vector<128x128xf32>
      %cst_16 = arith.constant 1.000000e+00 : f32
      %33 = vector.broadcast %cst_16 : f32 to vector<128x128xf32>
      %34 = arith.addf %33, %32 : vector<128x128xf32>
      %35 = arith.divf %33, %34 : vector<128x128xf32>
      %36 = arith.mulf %30, %35 : vector<128x128xf32>
      %37 = vector.extract_strided_slice %29 {offsets = [0, 128], sizes = [128, 128], strides = [1, 1]} : vector<128x256xf32> to vector<128x128xf32>
      %38 = arith.mulf %36, %37 : vector<128x128xf32>
      %39 = arith.truncf %38 : vector<128x128xf32> to vector<128x128xbf16>
      %c0_17 = arith.constant 0 : index
      %c0_18 = arith.constant 0 : index
      %c0_19 = arith.constant 0 : index
      %40 = vector.load %arg5[%c0_17, %c0_18, %c0_19] : memref<1x128x128xbf16, #tpu.memory_space<vmem>>, vector<1x128x128xbf16>
      %41 = vector.shape_cast %40 : vector<1x128x128xbf16> to vector<128x128xbf16>
      %cst_20 = arith.constant dense<0.000000e+00> : vector<128x128xf32>
      %42 = tpu.matmul %39, %41, %cst_20 {dimension_numbers = #tpu.dot_dimension_numbers<[1], [0], [0], [1], [0, 0, 1, 1], [], []>} : vector<128x128xbf16>, vector<128x128xbf16>, vector<128x128xf32> -> vector<128x128xf32>
      %c0_21 = arith.constant 0 : index
      %c0_22 = arith.constant 0 : index
      %43 = vector.load %arg9[%c0_21, %c0_22] : memref<128x128xf32, #tpu.memory_space<vmem>>, vector<128x128xf32>
      %44 = vector.broadcast %11 : vector<128x1xf32> to vector<128x128xf32>
      %45 = arith.mulf %44, %42 : vector<128x128xf32>
      %46 = arith.addf %43, %45 : vector<128x128xf32>
      %c0_23 = arith.constant 0 : index
      %c0_24 = arith.constant 0 : index
      %47 = vector.load %arg9[%c0_23, %c0_24] : memref<128x128xf32, #tpu.memory_space<vmem>>, vector<128x128xf32>
      tpu.vector_store %arg9[%c0_23, %c0_24], %46 {strides = array<i32>} : memref<128x128xf32, #tpu.memory_space<vmem>>, vector<128x128xf32>,
    } else {
    }
    %c3_i32 = arith.constant 3 : i32
    %24 = arith.cmpi eq, %arg1, %c3_i32 : i32
    %25 = arith.extui %24 : i1 to i32
    %c0_i32_11 = arith.constant 0 : i32
    %26 = arith.cmpi ne, %25, %c0_i32_11 : i32
    scf.if %26 {
      %c0_12 = arith.constant 0 : index
      %c0_13 = arith.constant 0 : index
      %27 = vector.load %arg9[%c0_12, %c0_13] : memref<128x128xf32, #tpu.memory_space<vmem>>, vector<128x128xf32>
      %c0_14 = arith.constant 0 : index
      %c0_15 = arith.constant 0 : index
      %28 = vector.load %arg8[%c0_14, %c0_15] : memref<128x128xf32, #tpu.memory_space<vmem>>, vector<128x128xf32>
      tpu.vector_store %arg8[%c0_14, %c0_15], %27 {strides = array<i32>} : memref<128x128xf32, #tpu.memory_space<vmem>>, vector<128x128xf32>,
    } else {
    }
    return
  }
  func.func @transform_0(%arg0: i32, %arg1: i32) -> (i32, i32) {
    %c0_i32 = arith.constant 0 : i32
    %c0_i32_0 = arith.constant 0 : i32
    return %arg0, %c0_i32 : i32, i32
  }
  func.func @transform_1(%arg0: i32, %arg1: i32) -> (i32, i32) {
    %c0_i32 = arith.constant 0 : i32
    %c0_i32_0 = arith.constant 0 : i32
    return %arg0, %c0_i32 : i32, i32
  }
  func.func @transform_2(%arg0: i32, %arg1: i32) -> (i32, i32, i32) {
    %c0_i32 = arith.constant 0 : i32
    %c0_i32_0 = arith.constant 0 : i32
    %c0_i32_1 = arith.constant 0 : i32
    return %arg1, %c0_i32, %c0_i32_0 : i32, i32, i32
  }
  func.func @transform_3(%arg0: i32, %arg1: i32) -> (i32, i32, i32) {
    %c0_i32 = arith.constant 0 : i32
    %c0_i32_0 = arith.constant 0 : i32
    %c0_i32_1 = arith.constant 0 : i32
    return %arg1, %c0_i32, %c0_i32_0 : i32, i32, i32
  }
  func.func @transform_4(%arg0: i32, %arg1: i32) -> (i32, i32) {
    %c0_i32 = arith.constant 0 : i32
    %c0_i32_0 = arith.constant 0 : i32
    %c0_i32_1 = arith.constant 0 : i32
    return %c0_i32, %c0_i32_0 : i32, i32
  }
  func.func @transform_5(%arg0: i32, %arg1: i32) -> (i32, i32) {
    %c0_i32 = arith.constant 0 : i32
    %c0_i32_0 = arith.constant 0 : i32
    %c0_i32_1 = arith.constant 0 : i32
    return %c0_i32, %c0_i32_0 : i32, i32
  }
  func.func @transform_6(%arg0: i32, %arg1: i32) -> (i32, i32) {
    %c0_i32 = arith.constant 0 : i32
    %c0_i32_0 = arith.constant 0 : i32
    return %arg0, %c0_i32 : i32, i32
  }
}

</mosaic_0001>

<bundles_post_ra>
// kernel: _lambda_.1
= control target key start
LH: loop header
LB: loop body
LE: loop exit
PB: predicated region body
PF: predicated region fallthrough
CT: control target
= control target key end

     0   :  { %11 = vsyncpa [#allocation4], 0  ;;  %s2924_s21 = smov 0   ;;  %s2926_s22 = smov 0   ;;  %s3704_s0 = inlined_call_operand.vmem [shape: f32[128,4], index: 0, kind: input, shape index: {}]   ;;  %s3705_s1 = inlined_call_operand.vmem [shape: bf16[128,128], index: 1, kind: input, shape index: {}]   ;;  %s3706_s2 = inlined_call_operand.vmem [shape: bf16[4,128,256], index: 2, kind: input, shape index: {}]   ;;  %s3707_s3 = inlined_call_operand.vmem [shape: bf16[4,128,128], index: 3, kind: input, shape index: {}]   ;;  %s3708_s4 = inlined_call_operand.vmem [shape: bf16[128,512], index: 4, kind: input, shape index: {}]   ;;  %s3709_s5 = inlined_call_operand.vmem [shape: bf16[256,128], index: 5, kind: input, shape index: {}]   ;;  %s3710_s6 = inlined_call_operand.hbm [shape: f32[128,128], index: 6, kind: output, shape index: {}]  }
   0x1   :  { %s2928_s23 = smov 0  }
   0x2 LB: > { %s2221_s24 = sadd.s32 4294967295, %s2881_s23   ;;  %s26_s25 = sadd.s32 1, %s2877_s22  ;;  %s2881_s23 = sphi %s2928_s23, %s17_s23   ;;  %s2877_s22 = sphi %s2926_s22, %s3749_s22   ;;  %s2873_s21 = sphi %s2924_s21, %s3748_s21  }
   0x3   : > { %p27_p0 = scmp.ge.s32.totalorder %s26_s25, 4  ;;  %p2226_p1 = scmp.ge.s32.totalorder %s2881_s23, 1 }
   0x4   : > { %p257_p2 = scmp.lt.s32.totalorder %s2881_s23, 5 }
   0x5   : > { %s3751_s25 = smov (%p27_p0, %s26_s25), 0 }
   0x6   : > { %p258_p3 = pnand %p2226_p1, %p257_p2 }
   0x8   : > { %261 = sbr.rel (%p258_p3) target bundleno = 1446 (0x5a6), region = 44 }
   0xf   : > { %p309_p4 = scmp.lt.s32.totalorder %s2873_s21, 3  ;;  %v2949_v0 = vld [vmem:[%s3705_s1] sm:$0xf]  ;;  %v2954_v1 = vld [vmem:[%s3705_s1 + $0x4] sm:$0xf]  ;;  %p2231_p5 = scmp.ne.s32.totalorder %s2873_s21, 0 }
  0x10   : > { %v2959_v2 = vld [vmem:[%s3705_s1 + $0x8] sm:$0xf]  ;;  %v2964_v3 = vld [vmem:[%s3705_s1 + $0xc] sm:$0xf]  ;;  %v2969_v4 = vld [vmem:[%s3705_s1 + $0x10] sm:$0xf]  ;;  %v2232_v35 = vcombine.low (!%p2231_p5), %v2949_v0, %v2954_v1 }
  0x11   : > { %3722 = vst [vmem:[#allocation6_spill] sm:$0xff] %v2969_v4  ;;  %s310_s12 = scalar_select %p309_p4, %s2873_s21, 3  ;;  %v2975_v5 = vld [vmem:[%s3705_s1 + $0x14] sm:$0xf]  ;;  %v2980_v6 = vld [vmem:[%s3705_s1 + $0x18] sm:$0xf] }
  0x12   : > { %3723 = vst [vmem:[#allocation7_spill] sm:$0xff] %v2980_v6  ;;  %v2985_v7 = vld [vmem:[%s3705_s1 + $0x1c] sm:$0xf]  ;;  %v2990_v8 = vld [vmem:[%s3705_s1 + $0x20] sm:$0xf]  ;;  %340 = sbr.rel (%p2231_p5) target bundleno = 607 (0x25f), region = 48  ;;  %v2233_v40 = vcombine.low (!%p2231_p5), %v2959_v2, %v2964_v3  ;;  %v2234_v46 = vcombine.low (!%p2231_p5), %v2969_v4, %v2975_v5 }
  0x13   : > { %3724 = vst [vmem:[#allocation8_spill] sm:$0xff] %v2985_v7  ;;  %3725 = vst [vmem:[#allocation9_spill] sm:$0xff] %v2990_v8  ;;  %v2995_v9 = vld [vmem:[%s3705_s1 + $0x24] sm:$0xf]  ;;  %s2373_s28 = sshll.u32 %s310_s12, 7  ;;  %s2374_s29 = sshll.u32 %s310_s12, 6  ;;  %v2235_v52 = vcombine.low (!%p2231_p5), %v2980_v6, %v2985_v7 }
  0x14   : > { %3726 = vst [vmem:[#allocation10_spill] sm:$0xff] %v2995_v9  ;;  %v3000_v10 = vld [vmem:[%s3705_s1 + $0x28] sm:$0xf]  ;;  %v3005_v11 = vld [vmem:[%s3705_s1 + $0x2c] sm:$0xf]  ;;  %s3010_s13 = scalar_lea.vmem %s3706_s2, %s2373_s28  ;;  %s3015_s16 = scalar_lea.vmem %s3707_s3, %s2374_s29  ;;  %v2883_v18 = vmov (!%p2231_p5), 0   ;;  %v2236_v36 = vcombine.low (!%p2231_p5), %v2990_v8, %v2995_v9 }
  0x15   : > { %3727 = vst [vmem:[#allocation11_spill] sm:$0xff] %v3000_v10  ;;  %3728 = vst [vmem:[#allocation12_spill] sm:$0xff] %v3005_v11  ;;  %v3020_v12 = vld [vmem:[%s3705_s1 + $0x30] sm:$0xf]  ;;  %v3025_v13 = vld [vmem:[%s3705_s1 + $0x34] sm:$0xf]  ;;  %613 = vmatprep.mubr.bf16.mxu0 (!%p2231_p5), %v2883_v18  ;;  %653 = vmatprep.mubr.bf16.mxu1 (!%p2231_p5), %v2883_v18  ;;  %v2237_v41 = vcombine.low (!%p2231_p5), %v3000_v10, %v3005_v11 }
  0x16   : > { %3729 = vst [vmem:[#allocation13_spill] sm:$0xff] %v3020_v12  ;;  %3730 = vst [vmem:[#allocation14_spill] sm:$0xff] %v3025_v13  ;;  %v3030_v14 = vld [vmem:[%s3705_s1 + $0x38] sm:$0xf]  ;;  %v3035_v15 = vld [vmem:[%s3705_s1 + $0x3c] sm:$0xf]  ;;  %v2238_v47 = vcombine.low (!%p2231_p5), %v3020_v12, %v3025_v13 }
  0x17   : > { %3731 = vst [vmem:[#allocation15_spill] sm:$0xff] %v3030_v14  ;;  %3732 = vst [vmem:[#allocation16_spill] sm:$0xff] %v3035_v15  ;;  %v2541_v16 = vld [vmem:[%s3708_s4 + $0x4] ss:$16 sps:$4 sm:$0xff] (!%p2231_p5)   ;;  %v2543_v17 = vld [vmem:[%s3708_s4] ss:$16 sps:$4 sm:$0xff] (!%p2231_p5)   ;;  %v2239_v53 = vcombine.low (!%p2231_p5), %v3030_v14, %v3035_v15 }
  0x18   : > { %581 = vmatprep.subr.bf16.mxu0 (!%p2231_p5), %v2541_v16  ;;  %2487 = vmatprep.subr.bf16.mxu1 (!%p2231_p5), %v2541_v16  ;;  %v2544_v19 = vld [vmem:[%s3708_s4 + $0x24] ss:$16 sps:$4 sm:$0xff] (!%p2231_p5)   ;;  %v2546_v20 = vld [vmem:[%s3708_s4 + $0x20] ss:$16 sps:$4 sm:$0xff] (!%p2231_p5)   ;;  %v2567_v33 = vld [vmem:[%s3708_s4 + $0xc] ss:$16 sps:$4 sm:$0xff] (!%p2231_p5)  }
  0x19   : > { %582 = vmatpush1.bf16.msra.mxu0 %v2543_v17  ;;  %2495 = vmatpush1.bf16.msra.mxu1 %v2543_v17  ;;  %v2547_v21 = vld [vmem:[%s3708_s4 + $0x44] ss:$16 sps:$4 sm:$0xff]   ;;  %v2549_v22 = vld [vmem:[%s3708_s4 + $0x40] ss:$16 sps:$4 sm:$0xff]   ;;  %v2565_v34 = vld [vmem:[%s3708_s4 + $0x8] ss:$16 sps:$4 sm:$0xff]  }
  0x1a   : > { %583 = vmatprep.subr.bf16.mxu0 %v2544_v19  ;;  %2488 = vmatprep.subr.bf16.mxu1 %v2544_v19  ;;  %v2550_v23 = vld [vmem:[%s3708_s4 + $0x64] ss:$16 sps:$4 sm:$0xff]   ;;  %v2552_v24 = vld [vmem:[%s3708_s4 + $0x60] ss:$16 sps:$4 sm:$0xff]   ;;  %v2570_v37 = vld [vmem:[%s3708_s4 + $0x2c] ss:$16 sps:$4 sm:$0xff]  }
  0x1b   : > { %v2553_v25 = vld [vmem:[%s3708_s4 + $0x84] ss:$16 sps:$4 sm:$0xff]   ;;  %v2555_v26 = vld [vmem:[%s3708_s4 + $0x80] ss:$16 sps:$4 sm:$0xff]   ;;  %v2568_v38 = vld [vmem:[%s3708_s4 + $0x28] ss:$16 sps:$4 sm:$0xff]  }
  0x1c   : > { %v2556_v27 = vld [vmem:[%s3708_s4 + $0xa4] ss:$16 sps:$4 sm:$0xff]   ;;  %v2558_v28 = vld [vmem:[%s3708_s4 + $0xa0] ss:$16 sps:$4 sm:$0xff]   ;;  %v2573_v39 = vld [vmem:[%s3708_s4 + $0x4c] ss:$16 sps:$4 sm:$0xff]  }
  0x1d   : > { %584 = vmatpush1.bf16.msra.mxu0 %v2546_v20  ;;  %2496 = vmatpush1.bf16.msra.mxu1 %v2546_v20  ;;  %v2559_v29 = vld [vmem:[%s3708_s4 + $0xc4] ss:$16 sps:$4 sm:$0xff]   ;;  %v2561_v30 = vld [vmem:[%s3708_s4 + $0xc0] ss:$16 sps:$4 sm:$0xff]   ;;  %v2571_v42 = vld [vmem:[%s3708_s4 + $0x48] ss:$16 sps:$4 sm:$0xff]  }
  0x1e   : > { %585 = vmatprep.subr.bf16.mxu0 %v2547_v21  ;;  %2489 = vmatprep.subr.bf16.mxu1 %v2547_v21  ;;  %v2562_v31 = vld [vmem:[%s3708_s4 + $0xe4] ss:$16 sps:$4 sm:$0xff]   ;;  %v2564_v32 = vld [vmem:[%s3708_s4 + $0xe0] ss:$16 sps:$4 sm:$0xff]   ;;  %v2576_v43 = vld [vmem:[%s3708_s4 + $0x6c] ss:$16 sps:$4 sm:$0xff]  }
  0x1f   : > { %v2574_v44 = vld [vmem:[%s3708_s4 + $0x68] ss:$16 sps:$4 sm:$0xff]   ;;  %v2579_v45 = vld [vmem:[%s3708_s4 + $0x8c] ss:$16 sps:$4 sm:$0xff]   ;;  %v2589_v57 = vld [vmem:[%s3709_s5 + $0x40] sm:$0xff]  }
  0x20   : > { %v2577_v48 = vld [vmem:[%s3708_s4 + $0x88] ss:$16 sps:$4 sm:$0xff]   ;;  %v2582_v49 = vld [vmem:[%s3708_s4 + $0xac] ss:$16 sps:$4 sm:$0xff]   ;;  %v2590_v58 = vld [vmem:[%s3709_s5] sm:$0xff]  }
  0x21   : > { %586 = vmatpush1.bf16.msra.mxu0 %v2549_v22  ;;  %2497 = vmatpush1.bf16.msra.mxu1 %v2549_v22  ;;  %v2580_v50 = vld [vmem:[%s3708_s4 + $0xa8] ss:$16 sps:$4 sm:$0xff]   ;;  %v2585_v51 = vld [vmem:[%s3708_s4 + $0xcc] ss:$16 sps:$4 sm:$0xff]   ;;  %v2593_v61 = vld [vmem:[%s3709_s5 + $0x50] sm:$0xff]  }
  0x22   : > { %587 = vmatprep.subr.bf16.mxu0 %v2550_v23  ;;  %2490 = vmatprep.subr.bf16.mxu1 %v2550_v23  ;;  %v2583_v54 = vld [vmem:[%s3708_s4 + $0xc8] ss:$16 sps:$4 sm:$0xff]   ;;  %v2588_v55 = vld [vmem:[%s3708_s4 + $0xec] ss:$16 sps:$4 sm:$0xff]   ;;  %v2594_v62 = vld [vmem:[%s3709_s5 + $0x10] sm:$0xff]  }
  0x23   : > { %v2586_v56 = vld [vmem:[%s3708_s4 + $0xe8] ss:$16 sps:$4 sm:$0xff]   ;;  %v2597_v17 = vld [vmem:[%s3709_s5 + $0x60] sm:$0xff]   ;;  %v2601_v21 = vld [vmem:[%s3709_s5 + $0x70] sm:$0xff]  }
  0x24   : > { %v2591_v59 = vld [vmem:[%s3709_s5 + $0x48] sm:$0xff]   ;;  %v2595_v63 = vld [vmem:[%s3709_s5 + $0x58] sm:$0xff]   ;;  %v2602_v22 = vld [vmem:[%s3709_s5 + $0x30] sm:$0xff]  }
  0x25   : > { %588 = vmatpush1.bf16.msra.mxu0 %v2552_v24  ;;  %2498 = vmatpush1.bf16.msra.mxu1 %v2552_v24  ;;  %v2592_v60 = vld [vmem:[%s3709_s5 + $0x8] sm:$0xff]   ;;  %v2596_v16 = vld [vmem:[%s3709_s5 + $0x18] sm:$0xff]  }
  0x26   : > { %589 = vmatprep.subr.bf16.mxu0 %v2553_v25  ;;  %2491 = vmatprep.subr.bf16.mxu1 %v2553_v25  ;;  %v2599_v19 = vld [vmem:[%s3709_s5 + $0x68] sm:$0xff]   ;;  %v2603_v23 = vld [vmem:[%s3709_s5 + $0x78] sm:$0xff]  }
  0x27   : > { %v2600_v20 = vld [vmem:[%s3709_s5 + $0x28] sm:$0xff]   ;;  %v2604_v24 = vld [vmem:[%s3709_s5 + $0x38] sm:$0xff]  }
  0x29   : > { %590 = vmatpush1.bf16.msra.mxu0 %v2555_v26  ;;  %2499 = vmatpush1.bf16.msra.mxu1 %v2555_v26 }
  0x2a   : > { %591 = vmatprep.subr.bf16.mxu0 %v2556_v27  ;;  %2492 = vmatprep.subr.bf16.mxu1 %v2556_v27 }
  0x2d   : > { %592 = vmatpush1.bf16.msra.mxu0 %v2558_v28  ;;  %2500 = vmatpush1.bf16.msra.mxu1 %v2558_v28 }
  0x2e   : > { %593 = vmatprep.subr.bf16.mxu0 %v2559_v29  ;;  %2493 = vmatprep.subr.bf16.mxu1 %v2559_v29 }
  0x31   : > { %594 = vmatpush1.bf16.msra.mxu0 %v2561_v30  ;;  %2501 = vmatpush1.bf16.msra.mxu1 %v2561_v30 }
  0x32   : > { %595 = vmatprep.subr.bf16.mxu0 %v2562_v31  ;;  %2494 = vmatprep.subr.bf16.mxu1 %v2562_v31 }
  0x35   : > { %596 = vmatpush1.bf16.msra.mxu0 %v2564_v32  ;;  %2502 = vmatpush1.bf16.msra.mxu1 %v2564_v32 }
  0x36   : > { %694 = vmatprep.subr.bf16.mxu1 %v2567_v33  ;;  %2375 = vmatprep.subr.bf16.mxu0 %v2589_v57 }
  0x38   : > { %614 = vmatmul.mubr.bf16.vlgmr.msra.gmra.mrb[0].mxu0 %v2232_v35  ;;  %654 = vmatmul.mubr.bf16.vlgmr.msra.gmra.mrb[0].mxu1 %v2236_v36 }
  0x39   : > { %695 = vmatpush1.bf16.msra.mxu1 %v2565_v34  ;;  %623 = vmatprep.mubr.bf16.mxu0 %v2883_v18 }
  0x3a   : > { %696 = vmatprep.subr.bf16.mxu1 %v2570_v37  ;;  %663 = vmatprep.mubr.bf16.mxu1 %v2883_v18 }
  0x3b   : > { %2376 = vmatpush3.bf16.msra.mxu0 %v2590_v58 }
  0x3c   : > { %2377 = vmatprep.subr.bf16.mxu0 %v2591_v59 }
  0x3d   : > { %697 = vmatpush1.bf16.msra.mxu1 %v2568_v38 }
  0x3e   : > { %698 = vmatprep.subr.bf16.mxu1 %v2573_v39 }
  0x3f   : > { %2378 = vmatpush3.bf16.msra.mxu0 %v2592_v60 }
  0x40   : > { %624 = vmatmul.mubr.bf16.gmra.mrb[4].mxu0 %v2233_v40  ;;  %664 = vmatmul.mubr.bf16.gmra.mrb[4].mxu1 %v2237_v41 }
  0x41   : > { %699 = vmatpush1.bf16.msra.mxu1 %v2571_v42  ;;  %633 = vmatprep.mubr.bf16.mxu0 %v2883_v18 }
  0x42   : > { %700 = vmatprep.subr.bf16.mxu1 %v2576_v43  ;;  %673 = vmatprep.mubr.bf16.mxu1 %v2883_v18 }
  0x43   : > { %2379 = vmatprep.subr.bf16.mxu0 %v2593_v61 }
  0x44   : > { %2380 = vmatpush3.bf16.msra.mxu0 %v2594_v62 }
  0x45   : > { %701 = vmatpush1.bf16.msra.mxu1 %v2574_v44  ;;  %2381 = vmatprep.subr.bf16.mxu0 %v2595_v63 }
  0x46   : > { %702 = vmatprep.subr.bf16.mxu1 %v2579_v45 }
  0x48   : > { %634 = vmatmul.mubr.bf16.gmra.mrb[8].mxu0 %v2234_v46  ;;  %674 = vmatmul.mubr.bf16.gmra.mrb[8].mxu1 %v2238_v47 }
  0x49   : > { %703 = vmatpush1.bf16.msra.mxu1 %v2577_v48  ;;  %643 = vmatprep.mubr.bf16.mxu0 %v2883_v18 }
  0x4a   : > { %704 = vmatprep.subr.bf16.mxu1 %v2582_v49  ;;  %683 = vmatprep.mubr.bf16.mxu1 %v2883_v18 }
  0x4b   : > { %2382 = vmatpush3.bf16.msra.mxu0 %v2596_v16 }
  0x4c   : > { %2383 = vmatprep.subr.bf16.mxu0 %v2597_v17 }
  0x4d   : > { %705 = vmatpush1.bf16.msra.mxu1 %v2580_v50 }
  0x4e   : > { %706 = vmatprep.subr.bf16.mxu1 %v2585_v51 }
  0x50   : > { %644 = vmatmul.mubr.bf16.gmra.mrb[12].mxu0 %v2235_v52  ;;  %684 = vmatmul.mubr.bf16.gmra.mrb[12].mxu1 %v2239_v53 }
  0x51   : > { %707 = vmatpush1.bf16.msra.mxu1 %v2583_v54  ;;  %726 = vmatprep.mubr.bf16.mxu1 %v2883_v18 }
  0x52   : > { %708 = vmatprep.subr.bf16.mxu1 %v2588_v55 }
  0x55   : > { %709 = vmatpush1.bf16.msra.mxu1 %v2586_v56 }
  0x58   : > { %727 = vmatmul.mubr.bf16.vlgmr.msra.gmra.mrb[16].mxu1 %v2232_v35 }
  0x59   : > { %736 = vmatprep.mubr.bf16.mxu1 %v2883_v18 }
  0x60   : > { %737 = vmatmul.mubr.bf16.gmra.mrb[20].mxu1 %v2233_v40 }
  0x61   : > { %746 = vmatprep.mubr.bf16.mxu1 %v2883_v18 }
  0x68   : > { %747 = vmatmul.mubr.bf16.gmra.mrb[24].mxu1 %v2234_v46 }
  0x69   : > { %756 = vmatprep.mubr.bf16.mxu1 %v2883_v18 }
  0x70   : > { %757 = vmatmul.mubr.bf16.gmra.mrb[28].mxu1 %v2235_v52 }
  0x71   : > { %766 = vmatprep.mubr.bf16.mxu1 %v2883_v18 }
  0x78   : > { %767 = vmatmul.mubr.bf16.gmra.mrb[32].mxu1 %v2236_v36 }
  0x79   : > { %776 = vmatprep.mubr.bf16.mxu1 %v2883_v18 }
  0x80   : > { %777 = vmatmul.mubr.bf16.gmra.mrb[36].mxu1 %v2237_v41 }
  0x81   : > { %786 = vmatprep.mubr.bf16.mxu1 %v2883_v18 }
  0x88   : > { %787 = vmatmul.mubr.bf16.gmra.mrb[40].mxu1 %v2238_v47 }
  0x89   : > { %796 = vmatprep.mubr.bf16.mxu1 %v2883_v18  ;;  %v2598_v18 = vld [vmem:[%s3709_s5 + $0x20] sm:$0xff]  }
  0x8a   : > { %2384 = vmatpush3.bf16.msra.mxu0 %v2598_v18 }
  0x8b   : > { %2385 = vmatprep.subr.bf16.mxu0 %v2599_v19 }
  0x8e   : > { %2386 = vmatpush3.bf16.msra.mxu0 %v2600_v20 }
  0x8f   : > { %2387 = vmatprep.subr.bf16.mxu0 %v2601_v21 }
  0x90   : > { %797 = vmatmul.mubr.bf16.gmra.mrb[44].mxu1 %v2239_v53 }
  0x92   : > { %2388 = vmatpush3.bf16.msra.mxu0 %v2602_v22 }
  0x93   : > { %2389 = vmatprep.subr.bf16.mxu0 %v2603_v23 }
  0x96   : > { %2390 = vmatpush3.bf16.msra.mxu0 %v2604_v24 }
 0x10b   : > { %v3214_v25 = vpop.f32.mrb[0].mxu0  ;;  %v3216_v26 = vpop.f32.mrb[0].mxu1 }
 0x10c   : > { %v2272_v27 = vmul.f32 -1.442695, %v3214_v25  ;;  %v3219_v28 = vpop.f32.mrb[1].mxu0  ;;  %v3221_v29 = vpop.f32.mrb[1].mxu1  ;;  %v2288_v37 = vmul.f32 -1.442695, %v3216_v26 }
 0x10d   : > { %v2273_v30 = vmul.f32 -1.442695, %v3219_v28  ;;  %v3224_v31 = vpop.f32.mrb[2].mxu0  ;;  %v3226_v32 = vpop.f32.mrb[2].mxu1  ;;  %v2289_v43 = vmul.f32 -1.442695, %v3221_v29 }
 0x10e   : > { %2605 = vpow2.f32 %v2272_v27  ;;  %v2274_v33 = vmul.f32 -1.442695, %v3224_v31  ;;  %v3229_v34 = vpop.f32.mrb[3].mxu0  ;;  %v3231_v35 = vpop.f32.mrb[3].mxu1  ;;  %v2290_v50 = vmul.f32 -1.442695, %v3226_v32 }
 0x10f   : > { %2607 = vpow2.f32 %v2273_v30  ;;  %v2275_v36 = vmul.f32 -1.442695, %v3229_v34  ;;  %v2291_v52 = vmul.f32 -1.442695, %v3231_v35 }
 0x110   : > { %2609 = vpow2.f32 %v2274_v33 }
 0x111   : > { %2611 = vpow2.f32 %v2275_v36 }
 0x113   : > { %v3235_v38 = vpop.f32.mrb[4].mxu0  ;;  %v3237_v39 = vpop.f32.mrb[4].mxu1 }
 0x114   : > { %v2276_v40 = vmul.f32 -1.442695, %v3235_v38  ;;  %v3240_v41 = vpop.f32.mrb[5].mxu0  ;;  %v3242_v42 = vpop.f32.mrb[5].mxu1  ;;  %v2292_v59 = vmul.f32 -1.442695, %v3237_v39 }
 0x115   : > { %v2277_v44 = vmul.f32 -1.442695, %v3240_v41  ;;  %v3246_v45 = vpop.f32.mrb[6].mxu0  ;;  %v3248_v46 = vpop.f32.mrb[6].mxu1  ;;  %v2293_v19 = vmul.f32 -1.442695, %v3242_v42 }
 0x116   : > { %2613 = vpow2.f32 %v2276_v40  ;;  %v2278_v47 = vmul.f32 -1.442695, %v3246_v45  ;;  %v3251_v48 = vpop.f32.mrb[7].mxu0  ;;  %v3253_v49 = vpop.f32.mrb[7].mxu1 }
 0x117   : > { %2615 = vpow2.f32 %v2288_v37 }
 0x118   : > { %v2606_v51 = vpop.eup %2605  ;;  %2617 = vpow2.f32 %v2277_v44 }
 0x119   : > { %v903_v53 = vadd.f32 1.0, %v2606_v51  ;;  %2619 = vpow2.f32 %v2289_v43  ;;  %v2608_v54 = vpop.eup %2607  ;;  %v2279_v51 = vmul.f32 -1.442695, %v3251_v48 }
 0x11a   : > { %2621 = vpow2.f32 %v2278_v47  ;;  %v904_v55 = vadd.f32 1.0, %v2608_v54  ;;  %v2610_v58 = vpop.eup %2609 }
 0x11b   : > { %2623 = vpow2.f32 %v2290_v50  ;;  %v3257_v56 = vpop.f32.mrb[8].mxu0  ;;  %v3259_v57 = vpop.f32.mrb[8].mxu1  ;;  %v905_v61 = vadd.f32 1.0, %v2610_v58 }
 0x11c   : > { %2625 = vpow2.f32 %v2291_v52  ;;  %v3262_v60 = vpop.f32.mrb[9].mxu0  ;;  %v3264_v62 = vpop.f32.mrb[9].mxu1 }
 0x11d   : > { %2627 = vrcp.f32 %v903_v53  ;;  %v3266_v63 = vpop.f32.mrb[10].mxu0  ;;  %v2612_v16 = vpop.eup %2611 }
 0x11e   : > { %2629 = vrcp.f32 %v904_v55  ;;  %v3268_v17 = vpop.f32.mrb[10].mxu1  ;;  %v906_v18 = vadd.f32 1.0, %v2612_v16  ;;  %v3271_v20 = vpop.f32.mrb[11].mxu0  ;;  %v2280_v16 = vmul.f32 -1.442695, %v3257_v56 }
 0x11f   : > { %2631 = vrcp.f32 %v905_v61  ;;  %v3273_v21 = vpop.f32.mrb[11].mxu1 }
 0x120   : > { %v2614_v22 = vpop.eup %2613  ;;  %2633 = vpow2.f32 %v2292_v59 }
 0x121   : > { %v2616_v23 = vpop.eup %2615  ;;  %2635 = vrcp.f32 %v906_v18  ;;  %v907_v24 = vadd.f32 1.0, %v2614_v22 }
 0x122   : > { %v2618_v27 = vpop.eup %2617  ;;  %2637 = vpow2.f32 %v2293_v19  ;;  %v919_v43 = vadd.f32 1.0, %v2616_v23 }
 0x123   : > { %v2620_v30 = vpop.eup %2619  ;;  %v908_v33 = vadd.f32 1.0, %v2618_v27  ;;  %v3275_v36 = vpop.f32.mrb[12].mxu0  ;;  %2639 = vrcp.f32 %v907_v24  ;;  %v2281_v24 = vmul.f32 -1.442695, %v3262_v60 }
 0x124   : > { %v3277_v37 = vpop.f32.mrb[12].mxu1  ;;  %v2622_v40 = vpop.eup %2621  ;;  %v920_v55 = vadd.f32 1.0, %v2620_v30 }
 0x125   : > { %v3279_v44 = vpop.f32.mrb[13].mxu0  ;;  %v2624_v47 = vpop.eup %2623  ;;  %v909_v50 = vadd.f32 1.0, %v2622_v40  ;;  %2641 = vrcp.f32 %v908_v33 }
 0x126   : > { %v3282_v52 = vpop.f32.mrb[13].mxu1  ;;  %v3284_v53 = vpop.f32.mrb[14].mxu0  ;;  %v921_v22 = vadd.f32 1.0, %v2624_v47 }
 0x127   : > { %v2626_v54 = vpop.eup %2625  ;;  %v3286_v58 = vpop.f32.mrb[14].mxu1  ;;  %2643 = vrcp.f32 %v909_v50  ;;  %v2282_v50 = vmul.f32 -1.442695, %v3266_v63 }
 0x128   : > { %v3288_v59 = vpop.f32.mrb[15].mxu0  ;;  %v2628_v61 = vpop.eup %2627  ;;  %2645 = vrcp.f32 %v919_v43  ;;  %v922_v33 = vadd.f32 1.0, %v2626_v54  ;;  %v2294_v43 = vmul.f32 -1.442695, %v3248_v46 }
 0x129   : > { %v3291_v18 = vpop.f32.mrb[15].mxu1  ;;  %v2630_v19 = vpop.eup %2629  ;;  %2647 = vpow2.f32 %v2279_v51  ;;  %v999_v30 = vmul.f32 %v2628_v61, %v3214_v25  ;;  %v2283_v25 = vmul.f32 -1.442695, %v3271_v20 }
 0x12a   : > { %v2632_v23 = vpop.eup %2631  ;;  %2649 = vrcp.f32 %v920_v55  ;;  %v1000_v14 = vmul.f32 %v2630_v19, %v3219_v28 }
 0x12b   : > { %v2634_v27 = vpop.eup %2633  ;;  %2651 = vpow2.f32 %v2280_v16  ;;  %v728_v15 = vpop.f32.mrb[16].mxu1  ;;  %v1001_v12 = vmul.f32 %v2632_v23, %v3224_v31  ;;  %v2284_v31 = vmul.f32 -1.442695, %v3275_v36 }
 0x12c   : > { %v2636_v40 = vpop.eup %2635  ;;  %2653 = vrcp.f32 %v921_v22  ;;  %v1031_v47 = vmul.f32 %v999_v30, %v728_v15  ;;  %v730_v51 = vpop.f32.mrb[17].mxu1  ;;  %v923_v28 = vadd.f32 1.0, %v2634_v27 }
 0x12d   : > { %v2638_v13 = vpop.eup %2637  ;;  %v1002_v10 = vmul.f32 %v2636_v40, %v3229_v34  ;;  %2655 = vpow2.f32 %v2281_v24  ;;  %v1032_v54 = vmul.f32 %v1000_v14, %v730_v51  ;;  %v732_v55 = vpop.f32.mrb[18].mxu1  ;;  %v2295_v34 = vmul.f32 -1.442695, %v3253_v49 }
 0x12e   : > { %2657 = vrcp.f32 %v922_v33  ;;  %v1033_v61 = vmul.f32 %v1001_v12, %v732_v55  ;;  %v734_v16 = vpop.f32.mrb[19].mxu1  ;;  %v2640_v19 = vpop.eup %2639  ;;  %v924_v15 = vadd.f32 1.0, %v2638_v13  ;;  %v2296_v40 = vmul.f32 -1.442695, %v3259_v57 }
 0x12f   : > { %2659 = vpow2.f32 %v2282_v50  ;;  %v1034_v22 = vmul.f32 %v1002_v10, %v734_v16  ;;  %v2642_v23 = vpop.eup %2641  ;;  %v1003_v27 = vmul.f32 %v2640_v19, %v3235_v38 }
 0x130   : > { %2661 = vpow2.f32 %v2294_v43  ;;  %v1063_v30 = vpack.c.bf16 %v1033_v61, %v1031_v47  ;;  %v1004_v33 = vmul.f32 %v2642_v23, %v3240_v41 }
 0x131   : > { %v2644_v11 = vpop.eup %2643  ;;  %2663 = vpow2.f32 %v2283_v25  ;;  %v1064_v24 = vpack.c.bf16 %v1034_v22, %v1032_v54  ;;  %v2297_v25 = vmul.f32 -1.442695, %v3264_v62 }
 0x132   : > { %v3303_v14 = vpop.eup %2645  ;;  %2665 = vrcp.f32 %v923_v28  ;;  %v1005_v50 = vmul.f32 %v2644_v11, %v3246_v45  ;;  %v2298_v45 = vmul.f32 -1.442695, %v3268_v17 }
 0x133   : > { %v2648_v12 = vpop.eup %2647  ;;  %2667 = vpow2.f32 %v2284_v31  ;;  %v738_v10 = vpop.f32.mrb[20].mxu1  ;;  %1239 = vmatprep.mubr.bf16.mxu0 %v1064_v24 }
 0x134   : > { %v3308_v13 = vpop.eup %2649  ;;  %2669 = vrcp.f32 %v924_v15  ;;  %v910_v43 = vadd.f32 1.0, %v2648_v12  ;;  %v3311_v47 = vmul.f32 %v1003_v27, %v738_v10  ;;  %v740_v51 = vpop.f32.mrb[21].mxu1  ;;  %1240 = vmatmul.mubr.bf16.vlgmr.msra.gmra.mrb[16].mxu0 %v1063_v30  ;;  %v2299_v15 = vmul.f32 -1.442695, %v3273_v21 }
 0x135   : > { %v2652_v38 = vpop.eup %2651  ;;  %2671 = vpow2.f32 %v2295_v34  ;;  %v3314_v41 = vmul.f32 %v1004_v33, %v740_v51  ;;  %v742_v54 = vpop.f32.mrb[22].mxu1  ;;  %v2300_v27 = vmul.f32 -1.442695, %v3277_v37 }
 0x136   : > { %v3316_v55 = vpop.eup %2653  ;;  %2673 = vrcp.f32 %v910_v43  ;;  %v911_v28 = vadd.f32 1.0, %v2652_v38  ;;  %v3318_v61 = vmul.f32 %v1005_v50, %v742_v54  ;;  %v744_v16 = vpop.f32.mrb[23].mxu1  ;;  %v2285_v54 = vmul.f32 -1.442695, %v3279_v44 }
 0x137   : > { %v2656_v11 = vpop.eup %2655  ;;  %2675 = vpow2.f32 %v2296_v40 }
 0x138   : > { %v3321_v19 = vpop.eup %2657  ;;  %2677 = vrcp.f32 %v911_v28  ;;  %v912_v31 = vadd.f32 1.0, %v2656_v11 }
 0x139   : > { %v2660_v23 = vpop.eup %2659  ;;  %2679 = vpow2.f32 %v2297_v25 }
 0x13a   : > { %v2662_v30 = vpop.eup %2661  ;;  %2681 = vrcp.f32 %v912_v31  ;;  %v913_v34 = vadd.f32 1.0, %v2660_v23  ;;  %v2286_v23 = vmul.f32 -1.442695, %v3284_v53 }
 0x13b   : > { %v2664_v24 = vpop.eup %2663  ;;  %2683 = vpow2.f32 %v2298_v45  ;;  %v748_v12 = vpop.f32.mrb[24].mxu1  ;;  %v925_v43 = vadd.f32 1.0, %v2662_v30  ;;  %v2301_v45 = vmul.f32 -1.442695, %v3282_v52  ;;  %v2302_v30 = vmul.f32 -1.442695, %v3286_v58 }
 0x13c   : > { %v3327_v33 = vpop.eup %2665  ;;  %2685 = vrcp.f32 %v913_v34  ;;  %v914_v40 = vadd.f32 1.0, %v2664_v24  ;;  %v750_v10 = vpop.f32.mrb[25].mxu1 }
 0x13d   : > { %v2668_v50 = vpop.eup %2667  ;;  %2687 = vpow2.f32 %v2299_v15  ;;  %v752_v51 = vpop.f32.mrb[26].mxu1 }
 0x13e   : > { %v3329_v38 = vpop.eup %2669  ;;  %2689 = vrcp.f32 %v914_v40  ;;  %v915_v25 = vadd.f32 1.0, %v2668_v50  ;;  %v754_v28 = vpop.f32.mrb[27].mxu1  ;;  %v2287_v40 = vmul.f32 -1.442695, %v3288_v59 }
 0x13f   : > { %v2672_v11 = vpop.eup %2671  ;;  %2691 = vpow2.f32 %v2300_v27  ;;  %v2303_v27 = vmul.f32 -1.442695, %v3291_v18 }
 0x140   : > { %v2674_v31 = vpop.eup %2673  ;;  %2693 = vrcp.f32 %v915_v25  ;;  %v926_v6 = vadd.f32 1.0, %v2672_v11 }
 0x141   : > { %v2676_v34 = vpop.eup %2675  ;;  %2695 = vrcp.f32 %v925_v43  ;;  %v1006_v15 = vmul.f32 %v2674_v31, %v3251_v48 }
 0x142   : > { %v2678_v24 = vpop.eup %2677  ;;  %2697 = vpow2.f32 %v2285_v54 }
 0x143   : > { %v2680_v50 = vpop.eup %2679  ;;  %v1007_v22 = vmul.f32 %v2678_v24, %v3257_v56  ;;  %2699 = vpow2.f32 %v2301_v45  ;;  %v1038_v8 = vmul.f32 %v1006_v15, %v744_v16  ;;  %v758_v25 = vpop.f32.mrb[28].mxu1  ;;  %v927_v15 = vadd.f32 1.0, %v2676_v34 }
 0x144   : > { %v2682_v9 = vpop.eup %2681  ;;  %2701 = vpow2.f32 %v2286_v23  ;;  %v3339_v43 = vpop.f32.mrb[29].mxu1  ;;  %v1015_v34 = vmul.f32 %v3303_v14, %v3216_v26 }
 0x145   : > { %v2684_v48 = vpop.eup %2683  ;;  %v1008_v31 = vmul.f32 %v2682_v9, %v3262_v60  ;;  %2703 = vpow2.f32 %v2302_v30  ;;  %v1066_v54 = vpack.c.bf16 %v1038_v8, %v3314_v41  ;;  %v1039_v7 = vmul.f32 %v1007_v22, %v748_v12  ;;  %v3343_v4 = vpop.f32.mrb[30].mxu1 }
 0x146   : > { %v2686_v56 = vpop.eup %2685  ;;  %2705 = vpow2.f32 %v2287_v40  ;;  %v3345_v45 = vpop.f32.mrb[31].mxu1  ;;  %v928_v9 = vadd.f32 1.0, %v2680_v50  ;;  %v3733_v8 = vpack.c.bf16 %v3318_v61, %v3311_v47 }
 0x147   : > { %v2688_v16 = vpop.eup %2687  ;;  %v1009_v11 = vmul.f32 %v2686_v56, %v3266_v63  ;;  %2707 = vpow2.f32 %v2303_v27  ;;  %1247 = vmatprep.mubr.bf16.mxu0 %v1066_v54  ;;  %v1040_v23 = vmul.f32 %v1008_v31, %v750_v10  ;;  %v1016_v63 = vmul.f32 %v3308_v13, %v3221_v29 }
 0x148   : > { %v2690_v24 = vpop.eup %2689  ;;  %2709 = vrcp.f32 %v926_v6  ;;  %1248 = vmatmul.mubr.bf16.gmra.mrb[20].mxu0 %v3733_v8  ;;  %v1017_v10 = vmul.f32 %v3316_v55, %v3226_v32  ;;  %v929_v6 = vadd.f32 1.0, %v2684_v48  ;;  %v930_v26 = vadd.f32 1.0, %v2688_v16 }
 0x149   : > { %v2692_v60 = vpop.eup %2691  ;;  %v1010_v41 = vmul.f32 %v2690_v24, %v3271_v20  ;;  %v1041_v22 = vmul.f32 %v1009_v11, %v752_v51  ;;  %2711 = vrcp.f32 %v927_v15  ;;  %v1018_v51 = vmul.f32 %v3321_v19, %v3231_v35 }
 0x14a   : > { %v2694_v12 = vpop.eup %2693  ;;  %2713 = vrcp.f32 %v928_v9  ;;  %v931_v15 = vadd.f32 1.0, %v2692_v60  ;;  %v1019_v9 = vmul.f32 %v3327_v33, %v3237_v39 }
 0x14b   : > { %v2696_v30 = vpop.eup %2695  ;;  %v1011_v47 = vmul.f32 %v2694_v12, %v3275_v36  ;;  %v1067_v61 = vpack.c.bf16 %v1041_v22, %v1039_v7  ;;  %v1042_v40 = vmul.f32 %v1010_v41, %v754_v28  ;;  %v768_v50 = vpop.f32.mrb[32].mxu1  ;;  %2715 = vrcp.f32 %v929_v6 }
 0x14c   : > { %v2698_v20 = vpop.eup %2697  ;;  %v3361_v14 = vmul.f32 %v1015_v34, %v768_v50  ;;  %v770_v29 = vpop.f32.mrb[33].mxu1  ;;  %v1020_v41 = vmul.f32 %v3329_v38, %v3242_v42  ;;  %v1021_v34 = vmul.f32 %v2696_v30, %v3248_v46 }
 0x14d   : > { %v2700_v13 = vpop.eup %2699  ;;  %v916_v27 = vadd.f32 1.0, %v2698_v20  ;;  %v1068_v32 = vpack.c.bf16 %v1042_v40, %v1040_v23  ;;  %v3363_v55 = vmul.f32 %v1011_v47, %v758_v25  ;;  %v3365_v48 = vmul.f32 %v1016_v63, %v770_v29  ;;  %v772_v36 = vpop.f32.mrb[34].mxu1 }
 0x14e   : > { %v2702_v7 = vpop.eup %2701  ;;  %v3367_v28 = vmul.f32 %v1017_v10, %v772_v36  ;;  %v774_v31 = vpop.f32.mrb[35].mxu1  ;;  %v932_v8 = vadd.f32 1.0, %v2700_v13 }
 0x14f   : > { %v2704_v54 = vpop.eup %2703  ;;  %2717 = vrcp.f32 %v916_v27  ;;  %v917_v35 = vadd.f32 1.0, %v2702_v7  ;;  %1255 = vmatprep.mubr.bf16.mxu0 %v1068_v32  ;;  %v3369_v19 = vmul.f32 %v1018_v51, %v774_v31 }
 0x150   : > { %v2706_v56 = vpop.eup %2705  ;;  %2719 = vrcp.f32 %v930_v26  ;;  %1256 = vmatmul.mubr.bf16.gmra.mrb[24].mxu0 %v1067_v61  ;;  %v1071_v25 = vpack.c.bf16 %v3367_v28, %v3361_v14  ;;  %v933_v22 = vadd.f32 1.0, %v2704_v54 }
 0x151   : > { %v2708_v16 = vpop.eup %2707  ;;  %2721 = vrcp.f32 %v917_v35  ;;  %v918_v11 = vadd.f32 1.0, %v2706_v56  ;;  %v1072_v23 = vpack.c.bf16 %v3369_v19, %v3365_v48 }
 0x152   : > { %v2710_v24 = vpop.eup %2709  ;;  %v934_v63 = vadd.f32 1.0, %v2708_v16 }
 0x153   : > { %2723 = vrcp.f32 %v918_v11  ;;  %v778_v12 = vpop.f32.mrb[36].mxu1  ;;  %v2712_v6 = vpop.eup %2711  ;;  %v1022_v47 = vmul.f32 %v2710_v24, %v3253_v49 }
 0x154   : > { %v3380_v60 = vmul.f32 %v1019_v9, %v778_v12  ;;  %v780_v10 = vpop.f32.mrb[37].mxu1  ;;  %2725 = vrcp.f32 %v931_v15  ;;  %v2714_v39 = vpop.eup %2713  ;;  %v1023_v26 = vmul.f32 %v2712_v6, %v3259_v57 }
 0x155   : > { %v1052_v61 = vmul.f32 %v1020_v41, %v780_v10  ;;  %v782_v40 = vpop.f32.mrb[38].mxu1  ;;  %2727 = vrcp.f32 %v932_v8  ;;  %v2716_v38 = vpop.eup %2715  ;;  %v1024_v13 = vmul.f32 %v2714_v39, %v3264_v62 }
 0x156   : > { %v1053_v33 = vmul.f32 %v1021_v34, %v782_v40  ;;  %v784_v50 = vpop.f32.mrb[39].mxu1  ;;  %2729 = vrcp.f32 %v933_v22  ;;  %v1025_v32 = vmul.f32 %v2716_v38, %v3268_v17 }
 0x157   : > { %v1054_v42 = vmul.f32 %v1022_v47, %v784_v50  ;;  %2731 = vrcp.f32 %v934_v63 }
 0x158   : > { %v1073_v46 = vpack.c.bf16 %v1053_v33, %v3380_v60 }
 0x159   : > { %v2718_v30 = vpop.eup %2717  ;;  %v1074_v20 = vpack.c.bf16 %v1054_v42, %v1052_v61 }
 0x15a   : > { %v2720_v51 = vpop.eup %2719  ;;  %v1012_v49 = vmul.f32 %v2718_v30, %v3279_v44 }
 0x15b   : > { %v2722_v29 = vpop.eup %2721  ;;  %v788_v27 = vpop.f32.mrb[40].mxu1  ;;  %v1026_v56 = vmul.f32 %v2720_v51, %v3273_v21 }
 0x15c   : > { %v1013_v36 = vmul.f32 %v2722_v29, %v3284_v53  ;;  %v1044_v7 = vmul.f32 %v1012_v49, %v3339_v43  ;;  %v1055_v31 = vmul.f32 %v1023_v26, %v788_v27  ;;  %v790_v54 = vpop.f32.mrb[41].mxu1 }
 0x15d   : > { %v2724_v35 = vpop.eup %2723  ;;  %v1056_v16 = vmul.f32 %v1024_v13, %v790_v54  ;;  %v792_v15 = vpop.f32.mrb[42].mxu1 }
 0x15e   : > { %v1014_v57 = vmul.f32 %v2724_v35, %v3288_v59  ;;  %v1045_v44 = vmul.f32 %v1013_v36, %v3343_v4  ;;  %v1057_v11 = vmul.f32 %v1025_v32, %v792_v15  ;;  %v794_v62 = vpop.f32.mrb[43].mxu1  ;;  %v2726_v24 = vpop.eup %2725 }
 0x15f   : > { %v1058_v9 = vmul.f32 %v1026_v56, %v794_v62  ;;  %v2728_v17 = vpop.eup %2727  ;;  %v1027_v21 = vmul.f32 %v2726_v24, %v3277_v37 }
 0x160   : > { %v1069_v53 = vpack.c.bf16 %v1045_v44, %v3363_v55  ;;  %v1046_v43 = vmul.f32 %v1014_v57, %v3345_v45  ;;  %v1075_v8 = vpack.c.bf16 %v1057_v11, %v1055_v31  ;;  %v2730_v41 = vpop.eup %2729  ;;  %v1028_v59 = vmul.f32 %v2728_v17, %v3282_v52 }
 0x161   : > { %v1076_v22 = vpack.c.bf16 %v1058_v9, %v1056_v16  ;;  %v2732_v12 = vpop.eup %2731  ;;  %v1029_v4 = vmul.f32 %v2730_v41, %v3286_v58 }
 0x162   : > { %v1070_v34 = vpack.c.bf16 %v1046_v43, %v1044_v7  ;;  %v1030_v6 = vmul.f32 %v2732_v12, %v3291_v18 }
 0x163   : > { %v798_v63 = vpop.f32.mrb[44].mxu1 }
 0x164   : > { %1263 = vmatprep.mubr.bf16.mxu0 %v1070_v34  ;;  %v1059_v60 = vmul.f32 %v1027_v21, %v798_v63  ;;  %v800_v10 = vpop.f32.mrb[45].mxu1 }
 0x165   : > { %1264 = vmatmul.mubr.bf16.gmra.mrb[28].mxu0 %v1069_v53  ;;  %v1060_v55 = vmul.f32 %v1028_v59, %v800_v10  ;;  %v802_v45 = vpop.f32.mrb[46].mxu1 }
 0x166   : > { %1271 = vmatprep.mubr.bf16.mxu0 %v1072_v23  ;;  %v1061_v47 = vmul.f32 %v1029_v4, %v802_v45  ;;  %v804_v37 = vpop.f32.mrb[47].mxu1 }
 0x167   : > { %v1062_v61 = vmul.f32 %v1030_v6, %v804_v37 }
 0x168   : > { %v1077_v40 = vpack.c.bf16 %v1061_v47, %v1059_v60 }
 0x169   : > { %v1078_v52 = vpack.c.bf16 %v1062_v61, %v1060_v55 }
 0x16d   : > { %1272 = vmatmul.mubr.bf16.gmra.mrb[32].mxu0 %v1071_v25 }
 0x16e   : > { %1279 = vmatprep.mubr.bf16.mxu0 %v1074_v20 }
 0x175   : > { %1280 = vmatmul.mubr.bf16.gmra.mrb[36].mxu0 %v1073_v46 }
 0x176   : > { %1287 = vmatprep.mubr.bf16.mxu0 %v1076_v22 }
 0x17d   : > { %1288 = vmatmul.mubr.bf16.gmra.mrb[40].mxu0 %v1075_v8 }
 0x17e   : > { %1295 = vmatprep.mubr.bf16.mxu0 %v1078_v52 }
 0x185   : > { %1296 = vmatmul.mubr.bf16.gmra.mrb[44].mxu0 %v1077_v40 }
 0x207   : > { %v2391_v58 = vpop.f32.mrb[16].mxu0 }
 0x208   : > { %v2392_v18 = vpop.f32.mrb[17].mxu0 }
 0x209   : > { %v2393_v39 = vadd.f32 %v2392_v18, %v2391_v58  ;;  %v2394_v48 = vpop.f32.mrb[18].mxu0 }
 0x20a   : > { %v2395_v19 = vpop.f32.mrb[19].mxu0 }
 0x20b   : > { %1304 = vst [vmem:[#allocation2] sm:$0xff] %v2393_v39  ;;  %v2396_v23 = vadd.f32 %v2395_v19, %v2394_v48 }
 0x20d   : > { %1305 = vst [vmem:[#allocation2 + $0x8] sm:$0xff] %v2396_v23 }
 0x21b   : > { %v2397_v33 = vpop.f32.mrb[20].mxu0 }
 0x21c   : > { %v2398_v50 = vpop.f32.mrb[21].mxu0 }
 0x21d   : > { %v2399_v42 = vadd.f32 %v2398_v50, %v2397_v33  ;;  %v2400_v38 = vpop.f32.mrb[22].mxu0 }
 0x21e   : > { %v2401_v14 = vpop.f32.mrb[23].mxu0 }
 0x21f   : > { %1306 = vst [vmem:[#allocation2 + $0x10] sm:$0xff] %v2399_v42  ;;  %v2402_v28 = vadd.f32 %v2401_v14, %v2400_v38 }
 0x221   : > { %1307 = vst [vmem:[#allocation2 + $0x18] sm:$0xff] %v2402_v28 }
 0x223   : > { %v2403_v25 = vpop.f32.mrb[24].mxu0 }
 0x224   : > { %v2404_v46 = vpop.f32.mrb[25].mxu0 }
 0x225   : > { %v2405_v30 = vadd.f32 %v2404_v46, %v2403_v25  ;;  %v2406_v20 = vpop.f32.mrb[26].mxu0 }
 0x226   : > { %v2407_v51 = vpop.f32.mrb[27].mxu0 }
 0x227   : > { %1308 = vst [vmem:[#allocation2 + $0x20] sm:$0xff] %v2405_v30  ;;  %v2408_v26 = vadd.f32 %v2407_v51, %v2406_v20 }
 0x229   : > { %1309 = vst [vmem:[#allocation2 + $0x28] sm:$0xff] %v2408_v26 }
 0x238   : > { %v2409_v49 = vpop.f32.mrb[28].mxu0 }
 0x239   : > { %v2410_v29 = vpop.f32.mrb[29].mxu0 }
 0x23a   : > { %v2411_v13 = vadd.f32 %v2410_v29, %v2409_v49  ;;  %v2412_v27 = vpop.f32.mrb[30].mxu0 }
 0x23b   : > { %v2413_v32 = vpop.f32.mrb[31].mxu0 }
 0x23c   : > { %1310 = vst [vmem:[#allocation2 + $0x30] sm:$0xff] %v2411_v13  ;;  %v2414_v36 = vadd.f32 %v2413_v32, %v2412_v27 }
 0x23e   : > { %1311 = vst [vmem:[#allocation2 + $0x38] sm:$0xff] %v2414_v36 }
 0x240   : > { %v2415_v7 = vpop.f32.mrb[32].mxu0 }
 0x241   : > { %v2416_v31 = vpop.f32.mrb[33].mxu0 }
 0x242   : > { %v2417_v54 = vadd.f32 %v2416_v31, %v2415_v7  ;;  %v2418_v35 = vpop.f32.mrb[34].mxu0 }
 0x243   : > { %v2419_v56 = vpop.f32.mrb[35].mxu0 }
 0x244   : > { %1312 = vst [vmem:[#allocation2 + $0x40] sm:$0xff] %v2417_v54  ;;  %v2420_v16 = vadd.f32 %v2419_v56, %v2418_v35 }
 0x246   : > { %1313 = vst [vmem:[#allocation2 + $0x48] sm:$0xff] %v2420_v16 }
 0x248   : > { %v2421_v15 = vpop.f32.mrb[36].mxu0 }
 0x249   : > { %v2422_v57 = vpop.f32.mrb[37].mxu0 }
 0x24a   : > { %v2423_v44 = vadd.f32 %v2422_v57, %v2421_v15  ;;  %v2424_v11 = vpop.f32.mrb[38].mxu0 }
 0x24b   : > { %v2425_v62 = vpop.f32.mrb[39].mxu0 }
 0x24c   : > { %1314 = vst [vmem:[#allocation2 + $0x50] sm:$0xff] %v2423_v44  ;;  %v2426_v24 = vadd.f32 %v2425_v62, %v2424_v11 }
 0x24e   : > { %1315 = vst [vmem:[#allocation2 + $0x58] sm:$0xff] %v2426_v24 }
 0x250   : > { %v2427_v9 = vpop.f32.mrb[40].mxu0 }
 0x251   : > { %v2428_v17 = vpop.f32.mrb[41].mxu0 }
 0x252   : > { %v2429_v53 = vadd.f32 %v2428_v17, %v2427_v9  ;;  %v2430_v43 = vpop.f32.mrb[42].mxu0 }
 0x253   : > { %v2431_v8 = vpop.f32.mrb[43].mxu0 }
 0x254   : > { %1316 = vst [vmem:[#allocation2 + $0x60] sm:$0xff] %v2429_v53  ;;  %v2432_v41 = vadd.f32 %v2431_v8, %v2430_v43 }
 0x256   : > { %1317 = vst [vmem:[#allocation2 + $0x68] sm:$0xff] %v2432_v41 }
 0x258   : > { %v2433_v22 = vpop.f32.mrb[44].mxu0 }
 0x259   : > { %v2434_v12 = vpop.f32.mrb[45].mxu0 }
 0x25a   : > { %v2435_v21 = vadd.f32 %v2434_v12, %v2433_v22  ;;  %v2436_v34 = vpop.f32.mrb[46].mxu0 }
 0x25b   : > { %v2437_v59 = vpop.f32.mrb[47].mxu0 }
 0x25c   : > { %1318 = vst [vmem:[#allocation2 + $0x70] sm:$0xff] %v2435_v21  ;;  %v2438_v63 = vadd.f32 %v2437_v59, %v2436_v34 }
 0x25e   : > { %1319 = vst [vmem:[#allocation2 + $0x78] sm:$0xff] %v2438_v63 }
 0x25f PF: > { %v1336_v4 = vlaneseq  ;;  %v1322_v60 = vld [vmem:[%s3704_s0 + $0x10] sm:$0xff]  ;;  %v1338_v10 = vstv %s2873_s21  ;;  %v1320_v55 = vld [vmem:[%s3704_s0] sm:$0xff]  ;;  %v1323_v45 = vld [vmem:[%s3704_s0 + $0x18] sm:$0xff]  ;;  %vm1356_vm0 = vcmask 31744  }
 0x260   : > { %v1321_v47 = vld [vmem:[%s3704_s0 + $0x8] sm:$0xff]  ;;  %v1324_v19 = vld [vmem:[%s3704_s0 + $0x20] sm:$0xff]  ;;  %v1327_v38 = vld [vmem:[%s3704_s0 + $0x38] sm:$0xff] }
 0x261   : > { %v1337_v6 = vand.u32 127, %v1336_v4  ;;  %v1325_v48 = vld [vmem:[%s3704_s0 + $0x28] sm:$0xff]  ;;  %v1326_v14 = vld [vmem:[%s3704_s0 + $0x30] sm:$0xff]  ;;  %v1328_v51 = vld [vmem:[%s3704_s0 + $0x40] sm:$0xff] }
 0x262   : > { %v1329_v20 = vld [vmem:[%s3704_s0 + $0x48] sm:$0xff]  ;;  %v1331_v27 = vld [vmem:[%s3704_s0 + $0x58] sm:$0xff]  ;;  %v1330_v32 = vld [vmem:[%s3704_s0 + $0x50] sm:$0xff] }
 0x263   : > { %vm3418_vm1 = vcmp.eq.s32.totalorder %v1337_v6, %v1338_v10  ;;  %v1333_v35 = vld [vmem:[%s3704_s0 + $0x68] sm:$0xff]  ;;  %v1332_v56 = vld [vmem:[%s3704_s0 + $0x60] sm:$0xff]  ;;  %v1335_v11 = vld [vmem:[%s3704_s0 + $0x78] sm:$0xff] }
 0x264   : > { %v1342_v61 = vsel %vm3418_vm1, %v1322_v60, 0.0  ;;  %v1340_v40 = vsel %vm3418_vm1, %v1320_v55, 0.0  ;;  %v1343_v52 = vsel %vm3418_vm1, %v1323_v45, 0.0  ;;  %v1341_v58 = vsel %vm3418_vm1, %v1321_v47, 0.0  ;;  %v1334_v62 = vld [vmem:[%s3704_s0 + $0x70] sm:$0xff] }
 0x265   : > { %v1363_v18 = vsel %vm1356_vm0, %v1342_v61, 0.0  ;;  %v1357_v39 = vsel %vm1356_vm0, %v1340_v40, 0.0  ;;  %v1366_v23 = vsel %vm1356_vm0, %v1343_v52, 0.0  ;;  %v1360_v33 = vsel %vm1356_vm0, %v1341_v58, 0.0 }
 0x266   : > { %1364 = vadd.xlane.f32.xlu1 %v1363_v18  ;;  %1358 = vadd.xlane.f32.xlu0 %v1357_v39  ;;  %v1345_v50 = vsel %vm3418_vm1, %v1325_v48, 0.0  ;;  %v1344_v42 = vsel %vm3418_vm1, %v1324_v19, 0.0  ;;  %v1347_v46 = vsel %vm3418_vm1, %v1327_v38, 0.0  ;;  %v1346_v30 = vsel %vm3418_vm1, %v1326_v14, 0.0 }
 0x267   : > { %v1372_v28 = vsel %vm1356_vm0, %v1345_v50, 0.0  ;;  %v1369_v25 = vsel %vm1356_vm0, %v1344_v42, 0.0  ;;  %v1378_v26 = vsel %vm1356_vm0, %v1347_v46, 0.0  ;;  %v1375_v49 = vsel %vm1356_vm0, %v1346_v30, 0.0 }
 0x268   : > { %v1349_v29 = vsel %vm3418_vm1, %v1329_v20, 0.0  ;;  %v1348_v13 = vsel %vm3418_vm1, %v1328_v51, 0.0  ;;  %v1351_v31 = vsel %vm3418_vm1, %v1331_v27, 0.0  ;;  %v1350_v54 = vsel %vm3418_vm1, %v1330_v32, 0.0 }
 0x269   : > { %v1384_v36 = vsel %vm1356_vm0, %v1349_v29, 0.0  ;;  %v1381_v7 = vsel %vm1356_vm0, %v1348_v13, 0.0  ;;  %v1390_v16 = vsel %vm1356_vm0, %v1351_v31, 0.0  ;;  %v1387_v15 = vsel %vm1356_vm0, %v1350_v54, 0.0 }
 0x26a   : > { %1367 = vadd.xlane.f32.xlu1 %v1366_v23  ;;  %1361 = vadd.xlane.f32.xlu0 %v1360_v33  ;;  %v1353_v57 = vsel %vm3418_vm1, %v1333_v35, 0.0  ;;  %v1352_v44 = vsel %vm3418_vm1, %v1332_v56, 0.0  ;;  %v1355_v17 = vsel %vm3418_vm1, %v1335_v11, 0.0  ;;  %v1354_v53 = vsel %vm3418_vm1, %v1334_v62, 0.0 }
 0x26b   : > { %v1396_v24 = vsel %vm1356_vm0, %v1353_v57, 0.0  ;;  %v1393_v9 = vsel %vm1356_vm0, %v1352_v44, 0.0  ;;  %v1402_v43 = vsel %vm1356_vm0, %v1355_v17, 0.0  ;;  %v1399_v8 = vsel %vm1356_vm0, %v1354_v53, 0.0 }
 0x26c   : > { %v2884_v45 = vmov 0.0  }
 0x26e   : > { %1373 = vadd.xlane.f32.xlu1 %v1372_v28  ;;  %1370 = vadd.xlane.f32.xlu0 %v1369_v25 }
 0x272   : > { %1379 = vadd.xlane.f32.xlu1 %v1378_v26  ;;  %1376 = vadd.xlane.f32.xlu0 %v1375_v49 }
 0x276   : > { %1385 = vadd.xlane.f32.xlu1 %v1384_v36  ;;  %1382 = vadd.xlane.f32.xlu0 %v1381_v7 }
 0x27a   : > { %1391 = vadd.xlane.f32.xlu1 %v1390_v16  ;;  %1388 = vadd.xlane.f32.xlu0 %v1387_v15 }
 0x27e   : > { %1397 = vadd.xlane.f32.xlu1 %v1396_v24  ;;  %1394 = vadd.xlane.f32.xlu0 %v1393_v9 }
 0x282   : > { %1403 = vadd.xlane.f32.xlu1 %v1402_v43  ;;  %1400 = vadd.xlane.f32.xlu0 %v1399_v8 }
 0x2f3   : > { %v3506_v41 = vpop.xlane.xlu1 %1364  ;;  %v3508_v22 = vpop.xlane.xlu0 %1358 }
 0x2f4   : > { %vm1407_vm4 = vcmp.ne.f32.partialorder %v3506_v41, 0.0  ;;  %vm1405_vm5 = vcmp.ne.f32.partialorder %v3508_v22, 0.0 }
 0x2f5   : > { %v1423_v61 = vsel %vm1407_vm4, 1.0, %v2884_v45  ;;  %v1421_v40 = vsel %vm1405_vm5, 1.0, %v2884_v45 }
 0x2f7   : > { %v3510_v12 = vpop.xlane.xlu1 %1367  ;;  %v3512_v21 = vpop.xlane.xlu0 %1361 }
 0x2f8   : > { %vm1408_vm6 = vcmp.ne.f32.partialorder %v3510_v12, 0.0  ;;  %vm1406_vm7 = vcmp.ne.f32.partialorder %v3512_v21, 0.0 }
 0x2f9   : > { %v1424_v52 = vsel %vm1408_vm6, 1.0, %v2884_v45  ;;  %v1422_v58 = vsel %vm1406_vm7, 1.0, %v2884_v45 }
 0x2fb   : > { %v3514_v34 = vpop.xlane.xlu1 %1373  ;;  %v3516_v59 = vpop.xlane.xlu0 %1370 }
 0x2fc   : > { %vm1410_vm2 = vcmp.ne.f32.partialorder %v3514_v34, 0.0  ;;  %vm1409_vm3 = vcmp.ne.f32.partialorder %v3516_v59, 0.0 }
 0x2fd   : > { %v1426_v47 = vsel %vm1410_vm2, 1.0, %v2884_v45  ;;  %v1425_v37 = vsel %vm1409_vm3, 1.0, %v2884_v45 }
 0x2fe   : > { %v1438_v48 = vmax.f32 %v1422_v58, %v1426_v47  ;;  %v1437_v19 = vmax.f32 %v1421_v40, %v1425_v37 }
 0x2ff   : > { %v3518_v63 = vpop.xlane.xlu1 %1379  ;;  %v3520_v4 = vpop.xlane.xlu0 %1376 }
 0x300   : > { %vm1412_vm8 = vcmp.ne.f32.partialorder %v3518_v63, 0.0  ;;  %vm1411_vm9 = vcmp.ne.f32.partialorder %v3520_v4, 0.0 }
 0x301   : > { %v1428_v18 = vsel %vm1412_vm8, 1.0, %v2884_v45  ;;  %v1427_v39 = vsel %vm1411_vm9, 1.0, %v2884_v45 }
 0x302   : > { %v1440_v28 = vmax.f32 %v1424_v52, %v1428_v18  ;;  %v1439_v25 = vmax.f32 %v1423_v61, %v1427_v39 }
 0x303   : > { %v3522_v60 = vpop.xlane.xlu1 %1385  ;;  %v3524_v10 = vpop.xlane.xlu0 %1382 }
 0x304   : > { %vm1414_vm10 = vcmp.ne.f32.partialorder %v3522_v60, 0.0  ;;  %vm1413_vm11 = vcmp.ne.f32.partialorder %v3524_v10, 0.0 }
 0x305   : > { %v1430_v23 = vsel %vm1414_vm10, 1.0, %v2884_v45  ;;  %v1429_v33 = vsel %vm1413_vm11, 1.0, %v2884_v45 }
 0x306   : > { %v1442_v20 = vmax.f32 %v1438_v48, %v1430_v23  ;;  %v1441_v51 = vmax.f32 %v1437_v19, %v1429_v33 }
 0x307   : > { %v3534_v6 = vpop.xlane.xlu1 %1391  ;;  %v3536_v55 = vpop.xlane.xlu0 %1388 }
 0x308   : > { %vm1416_vm12 = vcmp.ne.f32.partialorder %v3534_v6, 0.0  ;;  %vm1415_vm13 = vcmp.ne.f32.partialorder %v3536_v55, 0.0 }
 0x309   : > { %v1432_v38 = vsel %vm1416_vm12, 1.0, %v2884_v45  ;;  %v1431_v14 = vsel %vm1415_vm13, 1.0, %v2884_v45 }
 0x30a   : > { %v1444_v26 = vmax.f32 %v1440_v28, %v1432_v38  ;;  %v1443_v49 = vmax.f32 %v1439_v25, %v1431_v14 }
 0x30b   : > { %v3542_v50 = vpop.xlane.xlu1 %1397  ;;  %v3544_v42 = vpop.xlane.xlu0 %1394 }
 0x30c   : > { %vm1418_vm14 = vcmp.ne.f32.partialorder %v3542_v50, 0.0  ;;  %vm1417_vm15 = vcmp.ne.f32.partialorder %v3544_v42, 0.0 }
 0x30d   : > { %v1434_v46 = vsel %vm1418_vm14, 1.0, %v2884_v45  ;;  %v1433_v30 = vsel %vm1417_vm15, 1.0, %v2884_v45 }
 0x30e   : > { %v1446_v27 = vmax.f32 %v1442_v20, %v1434_v46  ;;  %v1445_v32 = vmax.f32 %v1441_v51, %v1433_v30 }
 0x30f   : > { %v3548_v29 = vpop.xlane.xlu1 %1403  ;;  %v3550_v13 = vpop.xlane.xlu0 %1400 }
 0x310   : > { %vm1420_vm0 = vcmp.ne.f32.partialorder %v3548_v29, 0.0  ;;  %vm1419_vm1 = vcmp.ne.f32.partialorder %v3550_v13, 0.0  ;;  %v1449_v35 = vmax.f32 %v1445_v32, %v1446_v27 }
 0x311   : > { %v1436_v36 = vsel %vm1420_vm0, 1.0, %v2884_v45  ;;  %v1435_v7 = vsel %vm1419_vm1, 1.0, %v2884_v45 }
 0x312   : > { %v1448_v31 = vmax.f32 %v1444_v26, %v1436_v36  ;;  %v1447_v54 = vmax.f32 %v1443_v49, %v1435_v7 }
 0x314   : > { %v1450_v56 = vmax.f32 %v1447_v54, %v1448_v31 }
 0x316   : > { %v1451_v16 = vmax.f32 %v1449_v35, %v1450_v56 }
 0x318   : > { %v1452_v15 = vrot.slane %v1451_v16, 4 }
 0x31a   : > { %v1453_v57 = vmax.f32 %v1451_v16, %v1452_v15 }
 0x31c   : > { %v1454_v44 = vrot.slane %v1453_v57, 2 }
 0x31e   : > { %v1455_v11 = vmax.f32 %v1453_v57, %v1454_v44 }
 0x320   : > { %v1456_v62 = vrot.slane %v1455_v11, 1 }
 0x322   : > { %v1457_v24 = vmax.f32 %v1455_v11, %v1456_v62 }
 0x324   : > { %2503 = vpush %v1457_v24 }
 0x355   : > { %s2504_s12 = spop %2503 }
 0x356   : > { %p1459_p6 = scmp.gt.f32.partialorder %s2504_s12, 0.0 }
 0x357   : > { %v2733_v9 = vld [vmem:[%s3010_s13 + $0x4] ss:$8 sps:$4 sm:$0xff] (%p1459_p6)   ;;  %v2735_v17 = vld [vmem:[%s3010_s13] ss:$8 sps:$4 sm:$0xff] (%p1459_p6)   ;;  %v2885_v53 = vmov (%p1459_p6), 0   ;;  %v2320_v33 = vcombine.low (%p1459_p6), %v2949_v0, %v2954_v1  ;;  %v2321_v38 = vcombine.low (%p1459_p6), %v2959_v2, %v2964_v3  ;;  %v3737_v25 = vld [vmem:[#allocation8_spill] sm:$0xff] (%p1459_p6) }
 0x358   : > { %1462 = sbr.rel (!%p1459_p6) target bundleno = 1410 (0x582), region = 52  ;;  %1639 = vmatprep.mubr.bf16.mxu0 (%p1459_p6), %v2885_v53  ;;  %1607 = vmatprep.subr.bf16.mxu0 (%p1459_p6), %v2733_v9  ;;  %v2736_v43 = vld [vmem:[%s3010_s13 + $0x14] ss:$8 sps:$4 sm:$0xff] (%p1459_p6)   ;;  %v2738_v8 = vld [vmem:[%s3010_s13 + $0x10] ss:$8 sps:$4 sm:$0xff] (%p1459_p6)   ;;  %v3736_v14 = vld [vmem:[#allocation6_spill] sm:$0xff] (%p1459_p6) }
 0x359   : > { %1608 = vmatpush1.bf16.msra.mxu0 (%p1459_p6), %v2735_v17  ;;  %v2739_v45 = vld [vmem:[%s3010_s13 + $0x24] ss:$8 sps:$4 sm:$0xff] (%p1459_p6)   ;;  %v2741_v47 = vld [vmem:[%s3010_s13 + $0x20] ss:$8 sps:$4 sm:$0xff] (%p1459_p6)   ;;  %v2742_v37 = vld [vmem:[%s3010_s13 + $0x34] ss:$8 sps:$4 sm:$0xff] (%p1459_p6)   ;;  %v2322_v28 = vcombine.low (%p1459_p6), %v3736_v14, %v2975_v5 }
 0x35a   : > { %1609 = vmatprep.subr.bf16.mxu0 (%p1459_p6), %v2736_v43  ;;  %v2744_v61 = vld [vmem:[%s3010_s13 + $0x30] ss:$8 sps:$4 sm:$0xff] (%p1459_p6)   ;;  %v2745_v40 = vld [vmem:[%s3010_s13 + $0x44] ss:$8 sps:$4 sm:$0xff] (%p1459_p6)   ;;  %v2747_v52 = vld [vmem:[%s3010_s13 + $0x40] ss:$8 sps:$4 sm:$0xff] (%p1459_p6)  }
 0x35b   : > { %v2748_v58 = vld [vmem:[%s3010_s13 + $0x54] ss:$8 sps:$4 sm:$0xff] (%p1459_p6)   ;;  %v2750_v18 = vld [vmem:[%s3010_s13 + $0x50] ss:$8 sps:$4 sm:$0xff] (%p1459_p6)   ;;  %v2751_v39 = vld [vmem:[%s3010_s13 + $0x64] ss:$8 sps:$4 sm:$0xff] (%p1459_p6)  }
 0x35c   : > { %v2753_v48 = vld [vmem:[%s3010_s13 + $0x60] ss:$8 sps:$4 sm:$0xff] (%p1459_p6)   ;;  %v2754_v19 = vld [vmem:[%s3010_s13 + $0x74] ss:$8 sps:$4 sm:$0xff] (%p1459_p6)   ;;  %v2756_v23 = vld [vmem:[%s3010_s13 + $0x70] ss:$8 sps:$4 sm:$0xff] (%p1459_p6)  }
 0x35d   : > { %1610 = vmatpush1.bf16.msra.mxu0 (%p1459_p6), %v2738_v8  ;;  %v3738_v46 = vld [vmem:[#allocation7_spill] sm:$0xff] (%p1459_p6)  ;;  %v3739_v0 = vld [vmem:[#allocation10_spill] sm:$0xff] (%p1459_p6)  ;;  %v3740_v1 = vld [vmem:[#allocation9_spill] sm:$0xff] (%p1459_p6) }
 0x35e   : > { %1611 = vmatprep.subr.bf16.mxu0 (%p1459_p6), %v2739_v45  ;;  %v2323_v30 = vcombine.low (%p1459_p6), %v3738_v46, %v3737_v25  ;;  %v2324_v20 = vcombine.low (%p1459_p6), %v3740_v1, %v3739_v0  ;;  %v3741_v2 = vld [vmem:[#allocation12_spill] sm:$0xff] (%p1459_p6)  ;;  %v3742_v3 = vld [vmem:[#allocation11_spill] sm:$0xff] (%p1459_p6)  ;;  %v3743_v5 = vld [vmem:[#allocation14_spill] sm:$0xff] (%p1459_p6) }
 0x35f   : > { %v2325_v51 = vcombine.low %v3742_v3, %v3741_v2  ;;  %v3744_v26 = vld [vmem:[#allocation13_spill] sm:$0xff]  ;;  %v3745_v27 = vld [vmem:[#allocation16_spill] sm:$0xff]  ;;  %v3746_v32 = vld [vmem:[#allocation15_spill] sm:$0xff] }
 0x360   : > { %v2326_v49 = vcombine.low %v3744_v26, %v3743_v5  ;;  %v2327_v36 = vcombine.low %v3746_v32, %v3745_v27  ;;  %v2757_v7 = vld [vmem:[%s3015_s16] sm:$0xff]   ;;  %v2758_v31 = vld [vmem:[%s3015_s16 + $0x8] sm:$0xff]   ;;  %v2759_v54 = vld [vmem:[%s3015_s16 + $0x10] sm:$0xff]  }
 0x361   : > { %1612 = vmatpush1.bf16.msra.mxu0 %v2741_v47  ;;  %2455 = vmatprep.subr.bf16.mxu1 %v2757_v7  ;;  %v2760_v35 = vld [vmem:[%s3015_s16 + $0x18] sm:$0xff]   ;;  %v2761_v56 = vld [vmem:[%s3015_s16 + $0x20] sm:$0xff]   ;;  %v2762_v16 = vld [vmem:[%s3015_s16 + $0x28] sm:$0xff]  }
 0x362   : > { %1613 = vmatprep.subr.bf16.mxu0 %v2742_v37  ;;  %2456 = vmatpush3.bf16.msra.mxu1 %v2757_v7  ;;  %v2763_v15 = vld [vmem:[%s3015_s16 + $0x30] sm:$0xff]   ;;  %v2764_v57 = vld [vmem:[%s3015_s16 + $0x38] sm:$0xff]  }
 0x363   : > { %2457 = vmatprep.subr.bf16.mxu1 %v2758_v31 }
 0x365   : > { %1614 = vmatpush1.bf16.msra.mxu0 %v2744_v61 }
 0x366   : > { %1615 = vmatprep.subr.bf16.mxu0 %v2745_v40  ;;  %2458 = vmatpush3.bf16.msra.mxu1 %v2758_v31 }
 0x367   : > { %2459 = vmatprep.subr.bf16.mxu1 %v2759_v54 }
 0x369   : > { %1616 = vmatpush1.bf16.msra.mxu0 %v2747_v52 }
 0x36a   : > { %1617 = vmatprep.subr.bf16.mxu0 %v2748_v58  ;;  %2460 = vmatpush3.bf16.msra.mxu1 %v2759_v54 }
 0x36b   : > { %2461 = vmatprep.subr.bf16.mxu1 %v2760_v35 }
 0x36d   : > { %1618 = vmatpush1.bf16.msra.mxu0 %v2750_v18 }
 0x36e   : > { %1619 = vmatprep.subr.bf16.mxu0 %v2751_v39  ;;  %2462 = vmatpush3.bf16.msra.mxu1 %v2760_v35 }
 0x36f   : > { %2463 = vmatprep.subr.bf16.mxu1 %v2761_v56 }
 0x371   : > { %1620 = vmatpush1.bf16.msra.mxu0 %v2753_v48 }
 0x372   : > { %1621 = vmatprep.subr.bf16.mxu0 %v2754_v19  ;;  %2464 = vmatpush3.bf16.msra.mxu1 %v2761_v56 }
 0x373   : > { %2465 = vmatprep.subr.bf16.mxu1 %v2762_v16 }
 0x375   : > { %1622 = vmatpush1.bf16.msra.mxu0 %v2756_v23 }
 0x376   : > { %2466 = vmatpush3.bf16.msra.mxu1 %v2762_v16 }
 0x377   : > { %2467 = vmatprep.subr.bf16.mxu1 %v2763_v15 }
 0x378   : > { %1640 = vmatmul.mubr.bf16.vlgmr.msra.gmra.mrb[0].mxu0 %v2320_v33 }
 0x379   : > { %1649 = vmatprep.mubr.bf16.mxu0 %v2885_v53 }
 0x37a   : > { %2468 = vmatpush3.bf16.msra.mxu1 %v2763_v15 }
 0x37b   : > { %2469 = vmatprep.subr.bf16.mxu1 %v2764_v57 }
 0x37e   : > { %2470 = vmatpush3.bf16.msra.mxu1 %v2764_v57 }
 0x380   : > { %1650 = vmatmul.mubr.bf16.gmra.mrb[4].mxu0 %v2321_v38 }
 0x381   : > { %1659 = vmatprep.mubr.bf16.mxu0 %v2885_v53 }
 0x388   : > { %1660 = vmatmul.mubr.bf16.gmra.mrb[8].mxu0 %v2322_v28 }
 0x389   : > { %1669 = vmatprep.mubr.bf16.mxu0 %v2885_v53 }
 0x390   : > { %1670 = vmatmul.mubr.bf16.gmra.mrb[12].mxu0 %v2323_v30 }
 0x391   : > { %1679 = vmatprep.mubr.bf16.mxu0 %v2885_v53 }
 0x398   : > { %1680 = vmatmul.mubr.bf16.gmra.mrb[16].mxu0 %v2324_v20 }
 0x399   : > { %1689 = vmatprep.mubr.bf16.mxu0 %v2885_v53 }
 0x3a0   : > { %1690 = vmatmul.mubr.bf16.gmra.mrb[20].mxu0 %v2325_v51 }
 0x3a1   : > { %1699 = vmatprep.mubr.bf16.mxu0 %v2885_v53 }
 0x3a8   : > { %1700 = vmatmul.mubr.bf16.gmra.mrb[24].mxu0 %v2326_v49 }
 0x3a9   : > { %1709 = vmatprep.mubr.bf16.mxu0 %v2885_v53 }
 0x3b0   : > { %1710 = vmatmul.mubr.bf16.gmra.mrb[28].mxu0 %v2327_v36 }
 0x44b   : > { %v1641_v44 = vpop.f32.mrb[0].mxu0 }
 0x44c   : > { %v2344_v11 = vmul.f32 -1.442695, %v1641_v44  ;;  %v1643_v62 = vpop.f32.mrb[1].mxu0 }
 0x44d   : > { %v1645_v24 = vpop.f32.mrb[2].mxu0 }
 0x44e   : > { %2765 = vpow2.f32 %v2344_v11  ;;  %v2345_v9 = vmul.f32 -1.442695, %v1645_v24  ;;  %v1647_v17 = vpop.f32.mrb[3].mxu0 }
 0x450   : > { %2767 = vpow2.f32 %v2345_v9 }
 0x453   : > { %v1651_v53 = vpop.f32.mrb[4].mxu0 }
 0x454   : > { %v2346_v43 = vmul.f32 -1.442695, %v1651_v53  ;;  %v1653_v8 = vpop.f32.mrb[5].mxu0 }
 0x455   : > { %v1655_v45 = vpop.f32.mrb[6].mxu0 }
 0x456   : > { %2769 = vpow2.f32 %v2346_v43  ;;  %v2347_v47 = vmul.f32 -1.442695, %v1655_v45  ;;  %v1657_v37 = vpop.f32.mrb[7].mxu0 }
 0x458   : > { %v2766_v61 = vpop.eup %2765  ;;  %2771 = vpow2.f32 %v2347_v47 }
 0x459   : > { %v1768_v40 = vadd.f32 1.0, %v2766_v61 }
 0x45a   : > { %v2768_v52 = vpop.eup %2767 }
 0x45b   : > { %2773 = vrcp.f32 %v1768_v40  ;;  %v1769_v58 = vadd.f32 1.0, %v2768_v52  ;;  %v3594_v18 = vpop.f32.mrb[8].mxu0 }
 0x45c   : > { %v2348_v39 = vmul.f32 -1.442695, %v3594_v18  ;;  %v3597_v48 = vpop.f32.mrb[9].mxu0 }
 0x45d   : > { %2775 = vrcp.f32 %v1769_v58  ;;  %v3599_v19 = vpop.f32.mrb[10].mxu0 }
 0x45e   : > { %2777 = vpow2.f32 %v2348_v39  ;;  %v2349_v23 = vmul.f32 -1.442695, %v3599_v19  ;;  %v3602_v33 = vpop.f32.mrb[11].mxu0 }
 0x460   : > { %v2770_v38 = vpop.eup %2769  ;;  %2779 = vpow2.f32 %v2349_v23 }
 0x461   : > { %v1770_v14 = vadd.f32 1.0, %v2770_v38 }
 0x462   : > { %v2772_v28 = vpop.eup %2771 }
 0x463   : > { %2781 = vrcp.f32 %v1770_v14  ;;  %v1771_v25 = vadd.f32 1.0, %v2772_v28  ;;  %v3604_v46 = vpop.f32.mrb[12].mxu0 }
 0x464   : > { %v2350_v30 = vmul.f32 -1.442695, %v3604_v46  ;;  %v3607_v0 = vpop.f32.mrb[13].mxu0 }
 0x465   : > { %v2774_v1 = vpop.eup %2773  ;;  %2783 = vrcp.f32 %v1771_v25  ;;  %v3609_v20 = vpop.f32.mrb[14].mxu0 }
 0x466   : > { %v1816_v2 = vmul.f32 %v2774_v1, %v1641_v44  ;;  %2785 = vpow2.f32 %v2350_v30  ;;  %v2351_v3 = vmul.f32 -1.442695, %v3609_v20  ;;  %v3612_v51 = vpop.f32.mrb[15].mxu0 }
 0x467   : > { %v2776_v5 = vpop.eup %2775 }
 0x468   : > { %v2778_v26 = vpop.eup %2777  ;;  %v1832_v49 = vmul.f32 %v1816_v2, %v1643_v62  ;;  %v1817_v27 = vmul.f32 %v2776_v5, %v1645_v24  ;;  %2787 = vpow2.f32 %v2351_v3 }
 0x469   : > { %v1772_v32 = vadd.f32 1.0, %v2778_v26 }
 0x46a   : > { %v2780_v36 = vpop.eup %2779  ;;  %v1833_v7 = vmul.f32 %v1817_v27, %v1647_v17 }
 0x46b   : > { %2789 = vrcp.f32 %v1772_v32  ;;  %v1773_v31 = vadd.f32 1.0, %v2780_v36  ;;  %v3614_v54 = vpop.f32.mrb[16].mxu0 }
 0x46c   : > { %v2352_v35 = vmul.f32 -1.442695, %v3614_v54  ;;  %v3617_v56 = vpop.f32.mrb[17].mxu0  ;;  %v1848_v16 = vpack.c.bf16 %v1833_v7, %v1832_v49 }
 0x46d   : > { %v2782_v15 = vpop.eup %2781  ;;  %2791 = vrcp.f32 %v1773_v31  ;;  %v3619_v57 = vpop.f32.mrb[18].mxu0 }
 0x46e   : > { %v1818_v44 = vmul.f32 %v2782_v15, %v1651_v53  ;;  %2793 = vpow2.f32 %v2352_v35  ;;  %v2353_v11 = vmul.f32 -1.442695, %v3619_v57  ;;  %v3622_v62 = vpop.f32.mrb[19].mxu0  ;;  %2471 = vmatprep.mubr.bf16.mxu1 %v1848_v16 }
 0x46f   : > { %v2784_v24 = vpop.eup %2783 }
 0x470   : > { %v2786_v9 = vpop.eup %2785  ;;  %v1834_v17 = vmul.f32 %v1818_v44, %v1653_v8  ;;  %v1819_v43 = vmul.f32 %v2784_v24, %v1655_v45  ;;  %2795 = vpow2.f32 %v2353_v11 }
 0x471   : > { %v1774_v47 = vadd.f32 1.0, %v2786_v9 }
 0x472   : > { %v2788_v61 = vpop.eup %2787  ;;  %v1835_v40 = vmul.f32 %v1819_v43, %v1657_v37 }
 0x473   : > { %2797 = vrcp.f32 %v1774_v47  ;;  %v1775_v52 = vadd.f32 1.0, %v2788_v61  ;;  %v3624_v58 = vpop.f32.mrb[20].mxu0 }
 0x474   : > { %v1849_v39 = vpack.c.bf16 %v1835_v40, %v1834_v17  ;;  %v2354_v53 = vmul.f32 -1.442695, %v3624_v58  ;;  %v3627_v23 = vpop.f32.mrb[21].mxu0 }
 0x475   : > { %v2790_v38 = vpop.eup %2789  ;;  %2799 = vrcp.f32 %v1775_v52  ;;  %v3629_v14 = vpop.f32.mrb[22].mxu0 }
 0x476   : > { %v1820_v8 = vmul.f32 %v2790_v38, %v3594_v18  ;;  %2801 = vpow2.f32 %v2354_v53  ;;  %v2355_v45 = vmul.f32 -1.442695, %v3629_v14  ;;  %v3633_v28 = vpop.f32.mrb[23].mxu0  ;;  %2472 = vmatmul.mubr.bf16.vlgmr.msra.gmra.mrb[0].mxu1 %v1849_v39 }
 0x477   : > { %v2792_v37 = vpop.eup %2791 }
 0x478   : > { %v2794_v25 = vpop.eup %2793  ;;  %v1836_v30 = vmul.f32 %v1820_v8, %v3597_v48  ;;  %v1821_v1 = vmul.f32 %v2792_v37, %v3599_v19  ;;  %2803 = vpow2.f32 %v2355_v45 }
 0x479   : > { %v1776_v2 = vadd.f32 1.0, %v2794_v25 }
 0x47a   : > { %v2796_v3 = vpop.eup %2795  ;;  %v1837_v5 = vmul.f32 %v1821_v1, %v3602_v33 }
 0x47b   : > { %2805 = vrcp.f32 %v1776_v2  ;;  %v1777_v26 = vadd.f32 1.0, %v2796_v3  ;;  %v1701_v18 = vpop.f32.mrb[24].mxu0 }
 0x47c   : > { %v1850_v49 = vpack.c.bf16 %v1837_v5, %v1836_v30  ;;  %v2356_v27 = vmul.f32 -1.442695, %v1701_v18  ;;  %v1703_v32 = vpop.f32.mrb[25].mxu0 }
 0x47d   : > { %v2798_v36 = vpop.eup %2797  ;;  %2807 = vrcp.f32 %v1777_v26  ;;  %v1705_v7 = vpop.f32.mrb[26].mxu0 }
 0x47e   : > { %v1822_v31 = vmul.f32 %v2798_v36, %v3604_v46  ;;  %2809 = vpow2.f32 %v2356_v27  ;;  %v2357_v48 = vmul.f32 -1.442695, %v1705_v7  ;;  %v1707_v35 = vpop.f32.mrb[27].mxu0  ;;  %2475 = vmatprep.mubr.bf16.mxu1 %v1850_v49 }
 0x47f   : > { %v2800_v19 = vpop.eup %2799 }
 0x480   : > { %v2802_v16 = vpop.eup %2801  ;;  %v1838_v15 = vmul.f32 %v1822_v31, %v3607_v0  ;;  %v1823_v33 = vmul.f32 %v2800_v19, %v3609_v20  ;;  %2811 = vpow2.f32 %v2357_v48 }
 0x481   : > { %v1778_v44 = vadd.f32 1.0, %v2802_v16 }
 0x482   : > { %v2804_v11 = vpop.eup %2803  ;;  %v1839_v24 = vmul.f32 %v1823_v33, %v3612_v51 }
 0x483   : > { %2813 = vrcp.f32 %v1778_v44  ;;  %v1779_v9 = vadd.f32 1.0, %v2804_v11  ;;  %v1711_v17 = vpop.f32.mrb[28].mxu0 }
 0x484   : > { %v1851_v43 = vpack.c.bf16 %v1839_v24, %v1838_v15  ;;  %v2358_v46 = vmul.f32 -1.442695, %v1711_v17  ;;  %v1713_v47 = vpop.f32.mrb[29].mxu0 }
 0x485   : > { %v2806_v61 = vpop.eup %2805  ;;  %2815 = vrcp.f32 %v1779_v9  ;;  %v1715_v40 = vpop.f32.mrb[30].mxu0 }
 0x486   : > { %v1824_v52 = vmul.f32 %v2806_v61, %v3614_v54  ;;  %2817 = vpow2.f32 %v2358_v46  ;;  %v2359_v0 = vmul.f32 -1.442695, %v1715_v40  ;;  %v1717_v39 = vpop.f32.mrb[31].mxu0  ;;  %2476 = vmatmul.mubr.bf16.gmra.mrb[4].mxu1 %v1851_v43  ;;  %v2019_v43 = vld [vmem:[#allocation2 + $0x10] sm:$0xff]  ;;  %v2017_v61 = vld [vmem:[#allocation2] sm:$0xff] }
 0x487   : > { %v2808_v20 = vpop.eup %2807 }
 0x488   : > { %v2810_v53 = vpop.eup %2809  ;;  %v1840_v38 = vmul.f32 %v1824_v52, %v3617_v56  ;;  %v1825_v51 = vmul.f32 %v2808_v20, %v3619_v57  ;;  %2819 = vpow2.f32 %v2359_v0  ;;  %v2018_v20 = vld [vmem:[#allocation2 + $0x8] sm:$0xff] }
 0x489   : > { %v1780_v8 = vadd.f32 1.0, %v2810_v53 }
 0x48a   : > { %v2812_v45 = vpop.eup %2811  ;;  %v1841_v37 = vmul.f32 %v1825_v51, %v3622_v62 }
 0x48b   : > { %2821 = vrcp.f32 %v1780_v8  ;;  %v1781_v25 = vadd.f32 1.0, %v2812_v45  ;;  %v2021_v8 = vld [vmem:[#allocation2 + $0x20] sm:$0xff] }
 0x48c   : > { %v1852_v30 = vpack.c.bf16 %v1841_v37, %v1840_v38  ;;  %v2023_v38 = vld [vmem:[#allocation2 + $0x30] sm:$0xff]  ;;  %v2024_v37 = vld [vmem:[#allocation2 + $0x38] sm:$0xff] }
 0x48d   : > { %v2814_v1 = vpop.eup %2813  ;;  %2823 = vrcp.f32 %v1781_v25 }
 0x48e   : > { %v1826_v54 = vmul.f32 %v2814_v1, %v3624_v58  ;;  %2479 = vmatprep.mubr.bf16.mxu1 %v1852_v30  ;;  %v2022_v1 = vld [vmem:[#allocation2 + $0x28] sm:$0xff] }
 0x48f   : > { %v2816_v2 = vpop.eup %2815 }
 0x490   : > { %v2818_v3 = vpop.eup %2817  ;;  %v1842_v5 = vmul.f32 %v1826_v54, %v3627_v23  ;;  %v1827_v56 = vmul.f32 %v2816_v2, %v3629_v14 }
 0x491   : > { %v1782_v57 = vadd.f32 1.0, %v2818_v3 }
 0x492   : > { %v2820_v26 = vpop.eup %2819  ;;  %v1843_v49 = vmul.f32 %v1827_v56, %v3633_v28  ;;  %v2027_v56 = vld [vmem:[#allocation2 + $0x50] sm:$0xff] }
 0x493   : > { %2825 = vrcp.f32 %v1782_v57  ;;  %v1783_v62 = vadd.f32 1.0, %v2820_v26  ;;  %v2025_v26 = vld [vmem:[#allocation2 + $0x40] sm:$0xff] }
 0x494   : > { %v1853_v27 = vpack.c.bf16 %v1843_v49, %v1842_v5 }
 0x495   : > { %v2822_v36 = vpop.eup %2821  ;;  %2827 = vrcp.f32 %v1783_v62  ;;  %v2028_v62 = vld [vmem:[#allocation2 + $0x58] sm:$0xff] }
 0x496   : > { %v1828_v31 = vmul.f32 %v2822_v36, %v1701_v18  ;;  %2480 = vmatmul.mubr.bf16.gmra.mrb[8].mxu1 %v1853_v27 }
 0x497   : > { %v2824_v48 = vpop.eup %2823 }
 0x498   : > { %v1844_v58 = vmul.f32 %v1828_v31, %v1703_v32  ;;  %v1829_v19 = vmul.f32 %v2824_v48, %v1705_v7  ;;  %v2026_v31 = vld [vmem:[#allocation2 + $0x48] sm:$0xff] }
 0x49a   : > { %v1845_v16 = vmul.f32 %v1829_v19, %v1707_v35  ;;  %v2020_v35 = vld [vmem:[#allocation2 + $0x18] sm:$0xff] }
 0x49c   : > { %v1854_v15 = vpack.c.bf16 %v1845_v16, %v1844_v58 }
 0x49d   : > { %v2826_v33 = vpop.eup %2825 }
 0x49e   : > { %v1830_v23 = vmul.f32 %v2826_v33, %v1711_v17  ;;  %2483 = vmatprep.mubr.bf16.mxu1 %v1854_v15  ;;  %v2031_v15 = vld [vmem:[#allocation2 + $0x70] sm:$0xff] }
 0x49f   : > { %v2828_v14 = vpop.eup %2827 }
 0x4a0   : > { %v1846_v44 = vmul.f32 %v1830_v23, %v1713_v47  ;;  %v1831_v11 = vmul.f32 %v2828_v14, %v1715_v40  ;;  %v2029_v23 = vld [vmem:[#allocation2 + $0x60] sm:$0xff] }
 0x4a2   : > { %v1847_v24 = vmul.f32 %v1831_v11, %v1717_v39 }
 0x4a4   : > { %v1855_v28 = vpack.c.bf16 %v1847_v24, %v1846_v44  ;;  %v2032_v44 = vld [vmem:[#allocation2 + $0x78] sm:$0xff] }
 0x4a6   : > { %2484 = vmatmul.mubr.bf16.gmra.mrb[12].mxu1 %v1855_v28  ;;  %v2030_v28 = vld [vmem:[#allocation2 + $0x68] sm:$0xff] }
 0x549   : > { %v2473_v9 = vpop.f32.mrb[0].mxu1 }
 0x54a   : > { %v2035_v46 = vmul.f32 %v2473_v9, %v3506_v41  ;;  %v1954_v18 = vpop.f32.mrb[1].mxu1 }
 0x54b   : > { %v2033_v32 = vmul.f32 %v1954_v18, %v3508_v22  ;;  %v2474_v7 = vpop.f32.mrb[2].mxu1 }
 0x54c   : > { %v2051_v52 = vadd.f32 %v2035_v46, %v2019_v43  ;;  %v2036_v17 = vmul.f32 %v2474_v7, %v3510_v12  ;;  %v1957_v0 = vpop.f32.mrb[3].mxu1 }
 0x54d   : > { %v2049_v47 = vadd.f32 %v2033_v32, %v2017_v61  ;;  %v2034_v40 = vmul.f32 %v1957_v0, %v3512_v21 }
 0x54e   : > { %2067 = vst [vmem:[#allocation2 + $0x10] sm:$0xff] %v2051_v52  ;;  %v2052_v39 = vadd.f32 %v2036_v17, %v2020_v35 }
 0x54f   : > { %2065 = vst [vmem:[#allocation2] sm:$0xff] %v2049_v47  ;;  %v2050_v53 = vadd.f32 %v2034_v40, %v2018_v20 }
 0x550   : > { %2068 = vst [vmem:[#allocation2 + $0x18] sm:$0xff] %v2052_v39 }
 0x551   : > { %2066 = vst [vmem:[#allocation2 + $0x8] sm:$0xff] %v2050_v53 }
 0x559   : > { %v2477_v41 = vpop.f32.mrb[4].mxu1 }
 0x55a   : > { %v2039_v22 = vmul.f32 %v2477_v41, %v3520_v4  ;;  %v1970_v51 = vpop.f32.mrb[5].mxu1 }
 0x55b   : > { %v2037_v45 = vmul.f32 %v1970_v51, %v3516_v59  ;;  %v2478_v12 = vpop.f32.mrb[6].mxu1 }
 0x55c   : > { %v2055_v25 = vadd.f32 %v2039_v22, %v2023_v38  ;;  %v2040_v30 = vmul.f32 %v2478_v12, %v3518_v63  ;;  %v1973_v21 = vpop.f32.mrb[7].mxu1 }
 0x55d   : > { %v2053_v54 = vadd.f32 %v2037_v45, %v2021_v8  ;;  %v2038_v2 = vmul.f32 %v1973_v21, %v3514_v34 }
 0x55e   : > { %2071 = vst [vmem:[#allocation2 + $0x30] sm:$0xff] %v2055_v25  ;;  %v2056_v3 = vadd.f32 %v2040_v30, %v2024_v37 }
 0x55f   : > { %2069 = vst [vmem:[#allocation2 + $0x20] sm:$0xff] %v2053_v54  ;;  %v2054_v5 = vadd.f32 %v2038_v2, %v2022_v1 }
 0x560   : > { %2072 = vst [vmem:[#allocation2 + $0x38] sm:$0xff] %v2056_v3 }
 0x561   : > { %2070 = vst [vmem:[#allocation2 + $0x28] sm:$0xff] %v2054_v5 }
 0x569   : > { %v2481_v4 = vpop.f32.mrb[8].mxu1 }
 0x56a   : > { %v2043_v59 = vmul.f32 %v2481_v4, %v3536_v55  ;;  %v1986_v57 = vpop.f32.mrb[9].mxu1 }
 0x56b   : > { %v2041_v49 = vmul.f32 %v1986_v57, %v3524_v10  ;;  %v2482_v63 = vpop.f32.mrb[10].mxu1 }
 0x56c   : > { %v2059_v27 = vadd.f32 %v2043_v59, %v2027_v56  ;;  %v2044_v36 = vmul.f32 %v2482_v63, %v3534_v6  ;;  %v1989_v34 = vpop.f32.mrb[11].mxu1 }
 0x56d   : > { %v2057_v48 = vadd.f32 %v2041_v49, %v2025_v26  ;;  %v2042_v58 = vmul.f32 %v1989_v34, %v3522_v60 }
 0x56e   : > { %2075 = vst [vmem:[#allocation2 + $0x50] sm:$0xff] %v2059_v27  ;;  %v2060_v19 = vadd.f32 %v2044_v36, %v2028_v62 }
 0x56f   : > { %2073 = vst [vmem:[#allocation2 + $0x40] sm:$0xff] %v2057_v48  ;;  %v2058_v16 = vadd.f32 %v2042_v58, %v2026_v31 }
 0x570   : > { %2076 = vst [vmem:[#allocation2 + $0x58] sm:$0xff] %v2060_v19 }
 0x571   : > { %2074 = vst [vmem:[#allocation2 + $0x48] sm:$0xff] %v2058_v16 }
 0x579   : > { %v2485_v55 = vpop.f32.mrb[12].mxu1 }
 0x57a   : > { %v2047_v10 = vmul.f32 %v2485_v55, %v3550_v13  ;;  %v2002_v33 = vpop.f32.mrb[13].mxu1 }
 0x57b   : > { %v2045_v14 = vmul.f32 %v2002_v33, %v3544_v42  ;;  %v2486_v6 = vpop.f32.mrb[14].mxu1 }
 0x57c   : > { %v2063_v11 = vadd.f32 %v2047_v10, %v2031_v15  ;;  %v2048_v24 = vmul.f32 %v2486_v6, %v3548_v29  ;;  %v2005_v60 = vpop.f32.mrb[15].mxu1 }
 0x57d   : > { %v2061_v9 = vadd.f32 %v2045_v14, %v2029_v23  ;;  %v2046_v43 = vmul.f32 %v2005_v60, %v3542_v50 }
 0x57e   : > { %2079 = vst [vmem:[#allocation2 + $0x70] sm:$0xff] %v2063_v11  ;;  %v2064_v46 = vadd.f32 %v2048_v24, %v2032_v44 }
 0x57f   : > { %2077 = vst [vmem:[#allocation2 + $0x60] sm:$0xff] %v2061_v9  ;;  %v2062_v18 = vadd.f32 %v2046_v43, %v2030_v28 }
 0x580   : > { %2080 = vst [vmem:[#allocation2 + $0x78] sm:$0xff] %v2064_v46 }
 0x581   : > { %2078 = vst [vmem:[#allocation2 + $0x68] sm:$0xff] %v2062_v18 }
 0x582 PF: > { %p2368_p7 = scmp.ne.s32.totalorder %s2873_s21, 3 }
 0x583   : > { %v2085_v42 = vld [vmem:[#allocation2] sm:$0xff] (!%p2368_p7)  ;;  %v2086_v13 = vld [vmem:[#allocation2 + $0x8] sm:$0xff] (!%p2368_p7)  ;;  %v2087_v61 = vld [vmem:[#allocation2 + $0x10] sm:$0xff] (!%p2368_p7) }
 0x584   : > { %2084 = sbr.rel (%p2368_p7) target bundleno = 1420 (0x58c), region = 56  ;;  %2101 = vst [vmem:[#allocation3] sm:$0xff] (!%p2368_p7), %v2085_v42  ;;  %2102 = vst [vmem:[#allocation3 + $0x8] sm:$0xff] (!%p2368_p7), %v2086_v13  ;;  %v2088_v29 = vld [vmem:[#allocation2 + $0x18] sm:$0xff] (!%p2368_p7)  ;;  %v2089_v32 = vld [vmem:[#allocation2 + $0x20] sm:$0xff] (!%p2368_p7) }
 0x585   : > { %2103 = vst [vmem:[#allocation3 + $0x10] sm:$0xff] (!%p2368_p7), %v2087_v61  ;;  %v2090_v7 = vld [vmem:[#allocation2 + $0x28] sm:$0xff] (!%p2368_p7)  ;;  %2104 = vst [vmem:[#allocation3 + $0x18] sm:$0xff] (!%p2368_p7), %v2088_v29  ;;  %v2091_v50 = vld [vmem:[#allocation2 + $0x30] sm:$0xff] (!%p2368_p7) }
 0x586   : > { %2105 = vst [vmem:[#allocation3 + $0x20] sm:$0xff] (!%p2368_p7), %v2089_v32  ;;  %2106 = vst [vmem:[#allocation3 + $0x28] sm:$0xff] (!%p2368_p7), %v2090_v7  ;;  %v2092_v35 = vld [vmem:[#allocation2 + $0x38] sm:$0xff] (!%p2368_p7)  ;;  %v2093_v52 = vld [vmem:[#allocation2 + $0x40] sm:$0xff] (!%p2368_p7) }
 0x587   : > { %2107 = vst [vmem:[#allocation3 + $0x30] sm:$0xff] (!%p2368_p7), %v2091_v50  ;;  %2108 = vst [vmem:[#allocation3 + $0x38] sm:$0xff] (!%p2368_p7), %v2092_v35  ;;  %v2094_v17 = vld [vmem:[#allocation2 + $0x48] sm:$0xff] (!%p2368_p7)  ;;  %v2095_v0 = vld [vmem:[#allocation2 + $0x50] sm:$0xff] (!%p2368_p7) }
 0x588   : > { %2109 = vst [vmem:[#allocation3 + $0x40] sm:$0xff] (!%p2368_p7), %v2093_v52  ;;  %v2096_v20 = vld [vmem:[#allocation2 + $0x58] sm:$0xff] (!%p2368_p7)  ;;  %2110 = vst [vmem:[#allocation3 + $0x48] sm:$0xff] (!%p2368_p7), %v2094_v17  ;;  %v2097_v47 = vld [vmem:[#allocation2 + $0x60] sm:$0xff] (!%p2368_p7) }
 0x589   : > { %2111 = vst [vmem:[#allocation3 + $0x50] sm:$0xff] (!%p2368_p7), %v2095_v0  ;;  %2112 = vst [vmem:[#allocation3 + $0x58] sm:$0xff] (!%p2368_p7), %v2096_v20  ;;  %v2098_v40 = vld [vmem:[#allocation2 + $0x68] sm:$0xff] (!%p2368_p7)  ;;  %v2099_v39 = vld [vmem:[#allocation2 + $0x70] sm:$0xff] (!%p2368_p7) }
 0x58a   : > { %2113 = vst [vmem:[#allocation3 + $0x60] sm:$0xff] (!%p2368_p7), %v2097_v47  ;;  %2114 = vst [vmem:[#allocation3 + $0x68] sm:$0xff] (!%p2368_p7), %v2098_v40  ;;  %v2100_v53 = vld [vmem:[#allocation2 + $0x78] sm:$0xff] (!%p2368_p7) }
 0x58b   : > { %2115 = vst [vmem:[#allocation3 + $0x70] sm:$0xff] %v2099_v39  ;;  %2116 = vst [vmem:[#allocation3 + $0x78] sm:$0xff] %v2100_v53 }
 0x58c PF: > { %p3669_p8 = scmp.eq.s32.totalorder %s2221_s24, 3  ;;  %s2886_s13 = smov [#allocation3]  }
 0x58d   : > { %s2126_s16 = sshll.u32 %s2886_s13, 4  ;;  %s2127_s16 = int_to_ptr.vmem [resolvable:$true] %s2126_s16 }
 0x58e   : > { %s2829_s17 = scalar_lea.vmem %s2127_s16, 2048  ;;  %p2836_p12 = scmp.lt.s32.totalorder %s2127_s16, %s2127_s16 }
 0x58f   : > { %p2830_p9 = scmp.ne.s32.totalorder %s2127_s16, %s2829_s17  ;;  %p2837_p13 = scmp.lt.s32.totalorder %s2829_s17, %s2829_s17 }
 0x591   : > { %p2831_p10 = pnand %p2830_p9, %p3669_p8  ;;  %p2838_p0 = por %p2837_p13, %p2836_p12 }
 0x593   : > { %p2832_p11 = pneg %p2831_p10 }
 0x595   : > { %p2839_p1 = pnand %p2838_p0, %p2832_p11 }
 0x597   : > { %2842 = shalt.err (!%p2839_p1)
}
 0x598   : > { %s2843_s24 = scalar_lea.hbm %s3710_s6, 2048 }
 0x599   : > { %p2844_p2 = scmp.ne.s32.totalorder %s3710_s6, %s2843_s24  ;;  %p2849_p5 = scmp.lt.u32.totalorder %s2843_s24, %s3710_s6 }
 0x59b   : > { %p2845_p3 = pnand %p2844_p2, %p3669_p8 }
 0x59d   : > { %p2846_p4 = pneg %p2845_p3 }
 0x59f   : > { %p2851_p6 = pnand %p2849_p5, %p2846_p4 }
 0x5a1   : > { %2854 = shalt.err (!%p2851_p6)
}
 0x5a2   : > { %s2887_s29 = smov 128   ;;  %s2888_s30 = smov 8  }
 0x5a3   : > { %2506 = dma.vmem_to_hbm [thread:$0]  (%p3669_p8), %s2127_s16, 2048, %s3710_s6, [#allocation4], %s2887_s29, %s2887_s29, %s2888_s30  }
 0x5a4   : > { %2868 = dma.done.wait (%p3669_p8), [#allocation4], 2048  }
 0x5a5   : > { %2870 = vsyncadd (%p3669_p8), [#allocation4], 4294965248 }
 0x5a6 PF: > { %s17_s23 = sadd.s32 1, %s2881_s23   ;;  %s3748_s21 = smov %s2877_s22 }
 0x5a7   : > { %p14_p7 = scmp.ge.s32.totalorder %s17_s23, 6   ;;  %s3749_s22 = smov %s3751_s25 }
 0x5a9   :  { %16 = sbr.rel (!%p14_p7) target bundleno = 2 (0x2), region = 93 }
 0x5b0   :  { %2142 = vsyncpa [#allocation4], 1 }
 0x5b1   :  { %2144 = vsyncpa [#allocation4 + $0x1], 1 }

</bundles_post_ra>
